<compile_context>
chip_gen: v5e
topology: v5e:2x2
jax: 0.10.0
libtpu: 0.0.40
codegen_flags: <defaults>
</compile_context>

<pallas_src>
from functools import partial
import math

import jax
import jax.numpy as jnp
from jax import lax
from jax.experimental import pallas as pl
from jax.experimental.pallas import tpu as pltpu

_NEG_INF = -1e30  # softmax mask value (exp underflows to exactly 0 in f32)


# --------------------------- Pallas fused kernel ------------------------------

def _prob_attn_ctx_kernel(scale, mask_flag, approx_recip,
                          q_ref, k_ref, v_ref, qs_ref, ql_ref, o_ref):
    """For a group of G (batch*head) slices:
         scores  = (Q_top * scale) @ K^T , ProbMask (causal), softmax, @ V
         context = cumsum(V)  (mask_flag)  /  mean(V) broadcast  (else)
         context[top-u rows] = attention rows        (one-hot MXU scatter)

    q_ref:  (G, u_pad, D)   gathered top-u queries (padded rows are zeros)
    k_ref:  (G, L_K, D)     keys
    v_ref:  (G, L_V, D)     values
    qs_ref: (G, u_pad, 1)   original query positions (sublane orientation; pad = L_Q)
    ql_ref: (G, 1, u_pad)   original query positions (lane orientation;   pad = L_Q)
    o_ref:  (G, L_Q, D)     full context rows for these slices (f32)
    """
    G, u_pad, D = q_ref.shape
    L_V = v_ref.shape[1]
    L_Q = o_ref.shape[1]
    in_dt = k_ref.dtype
    f32 = jnp.float32

    # Fold the softmax scale into Q: (G,u_pad,D) multiply instead of (G,u_pad,L_K).
    q = q_ref[...] * scale

    # Q @ K^T, batched over G, contracting on D (no materialized transpose).
    scores = lax.dot_general(
        q, k_ref[...], dimension_numbers=(((2,), (2,)), ((0,), (0,))),
        preferred_element_type=f32)                                # (G,u_pad,L_K)

    if mask_flag:
        # ProbMask: key position j is masked for the query originally at
        # position i whenever j > i (causal).  Padded rows have qs = L_Q.
        kpos = lax.broadcasted_iota(jnp.int32, scores.shape, 2)
        scores = jnp.where(kpos > qs_ref[...], _NEG_INF, scores)

    # Numerically stable softmax with a single exp.
    m = jnp.max(scores, axis=-1, keepdims=True)
    e = jnp.exp(scores - m)
    s = jnp.sum(e, axis=-1, keepdims=True)
    if approx_recip:
        p = e * pl.reciprocal(s, approx=True)      # EUP slot, ~free
    else:
        p = e / s                                  # exact path for f32 checks

    attn = lax.dot_general(
        p.astype(in_dt), v_ref[...],
        dimension_numbers=(((2,), (1,)), ((0,), (0,))),
        preferred_element_type=f32)                                # (G,u_pad,D)

    v = v_ref[...]
    # Hoisted constants (JAX does not CSE broadcast_in_dim inside the g-loop).
    lpos = lax.broadcasted_iota(jnp.int32, (L_Q, u_pad), 0)        # (L_Q,u_pad)
    if mask_flag:
        r = lax.broadcasted_iota(jnp.int32, (L_Q, L_V), 0)
        c = lax.broadcasted_iota(jnp.int32, (L_Q, L_V), 1)
        tril = (c <= r).astype(in_dt)                              # (L_Q,L_V)

    for g in range(G):  # static unroll, G is small
        if mask_flag:
            # cumsum(V) as a lower-triangular matmul on the (idle) MXU.
            init = jnp.dot(tril, v[g], preferred_element_type=f32)  # (L_Q,D)
        else:
            init = jnp.broadcast_to(
                jnp.mean(v[g].astype(f32), axis=0, keepdims=True), (L_Q, D))

        # One-hot scatter: sel[l,i] = 1 iff selected query i sits at row l.
        # top-k indices are distinct; padded entries (= L_Q) never match.
        sel = (lpos == ql_ref[g]).astype(f32)                       # (L_Q,u_pad)
        scat = jnp.dot(sel, attn[g], preferred_element_type=f32)    # (L_Q,D)
        covered = jnp.max(sel, axis=1, keepdims=True)               # (L_Q,1)
        o_ref[g, :, :] = jnp.where(covered > 0.0, scat, init)


def _pick_group(BH, bytes_per_slice, *, max_group=16, min_steps=4,
                vmem_budget=24 * 1024 * 1024):
    """Largest divisor G of BH such that the grid keeps >= min_steps steps
    (pipelining / megacore), the double-buffered working set fits the VMEM
    budget, and (preferably) the step count is even (v7x: 2 TensorCores)."""
    min_steps = min(min_steps, BH)
    valid = []
    for g in range(1, min(BH, max_group) + 1):
        if BH % g:
            continue
        if BH // g < min_steps:
            continue
        if 2 * g * bytes_per_slice > vmem_budget:
            continue
        valid.append(g)
    if not valid:
        return 1
    even = [g for g in valid if (BH // g) % 2 == 0]
    return max(even) if even else max(valid)


def prob_attn_context_pallas(q_reduce, k, v, q_index, scale, L_Q, *,
                             mask_flag, compute_dtype=jnp.bfloat16, group=None,
                             approx_recip=None):
    """q_reduce: (BH, u, D); k: (BH, L_K, D); v: (BH, L_V, D); q_index: (BH, u).
    Returns the full context (BH, L_Q, D) in f32 (initial context with the
    top-u rows replaced by their attention output)."""
    BH, u, D = q_reduce.shape
    L_K = k.shape[1]
    L_V = v.shape[1]
    u_pad = ((u + 7) // 8) * 8
    if approx_recip is None:
        approx_recip = jnp.dtype(compute_dtype) != jnp.dtype(jnp.float32)

    # Cast the MXU/DMA inputs to the compute dtype in HBM (halves K/V traffic
    # for bf16); softmax math and accumulation stay f32 inside the kernel.
    q_c = q_reduce.astype(compute_dtype)
    k_c = k.astype(compute_dtype)
    v_c = v.astype(compute_dtype)
    idx = q_index.astype(jnp.int32)
    if u_pad != u:
        q_c = jnp.pad(q_c, ((0, 0), (0, u_pad - u), (0, 0)))
        # Out-of-range position => padded rows are inert in mask and scatter.
        idx = jnp.pad(idx, ((0, 0), (0, u_pad - u)), constant_values=L_Q)
    qpos_s = idx[:, :, None]        # (BH, u_pad, 1)  sublane orientation
    qpos_l = idx[:, None, :]        # (BH, 1, u_pad)  lane orientation

    in_b = jnp.dtype(compute_dtype).itemsize
    bytes_per_slice = (u_pad * D * in_b + L_K * D * in_b + L_V * D * in_b
                       + 2 * u_pad * 4 + L_Q * D * 4)
    G = group if group is not None else _pick_group(BH, bytes_per_slice)
    assert BH % G == 0
    est = 2 * G * bytes_per_slice                       # double-buffered blocks
    vmem_limit = int(min(48 * 1024 * 1024, max(32 * 1024 * 1024, 2 * est)))

    flops = (2 * BH * u_pad * D * (L_K + L_V)           # scores + attn@V
             + 2 * BH * u_pad * L_Q * D                  # one-hot scatter
             + (2 * BH * L_Q * L_V * D if mask_flag else BH * L_V * D))
    bytes_accessed = (BH * (u_pad + L_K + L_V) * D * in_b
                      + 2 * BH * u_pad * 4 + BH * L_Q * D * 4)
    cost = pl.CostEstimate(flops=int(flops),
                           transcendentals=int(BH * u_pad * L_K),
                           bytes_accessed=int(bytes_accessed))

    kernel = partial(_prob_attn_ctx_kernel, float(scale), bool(mask_flag),
                     bool(approx_recip))

    return pl.pallas_call(
        kernel,
        out_shape=jax.ShapeDtypeStruct((BH, L_Q, D), jnp.float32),
        grid=(BH // G,),
        in_specs=[
            pl.BlockSpec((G, u_pad, D), lambda i: (i, 0, 0)),
            pl.BlockSpec((G, L_K, D), lambda i: (i, 0, 0)),
            pl.BlockSpec((G, L_V, D), lambda i: (i, 0, 0)),
            pl.BlockSpec((G, u_pad, 1), lambda i: (i, 0, 0)),
            pl.BlockSpec((G, 1, u_pad), lambda i: (i, 0, 0)),
        ],
        out_specs=pl.BlockSpec((G, L_Q, D), lambda i: (i, 0, 0)),
        compiler_params=pltpu.CompilerParams(
            dimension_semantics=("parallel",),
            vmem_limit_bytes=vmem_limit),
        cost_estimate=cost,
    )(q_c, k_c, v_c, qpos_s, qpos_l)


# --------------------------------- JAX glue -----------------------------------

def _context_ref(q_reduce, k, v, m_top, scale, L_Q, mask_flag):
    """Pure-JAX reference of the fused kernel, for correctness checking."""
    BH, _, D = q_reduce.shape
    scores = jnp.einsum('bud,bkd->buk', q_reduce, k) * scale
    if mask_flag:
        kpos = jnp.arange(k.shape[1], dtype=jnp.int32)[None, None, :]
        scores = jnp.where(kpos > m_top[..., None], -jnp.inf, scores)
    attn = jax.nn.softmax(scores, axis=-1)
    rows = jnp.einsum('buk,bkd->bud', attn, v)
    if mask_flag:
        ctx = jnp.cumsum(v, axis=1)
    else:
        ctx = jnp.broadcast_to(jnp.mean(v, axis=1, keepdims=True), (BH, L_Q, D))
    bh = jnp.arange(BH, dtype=jnp.int32)[:, None]
    return ctx.at[bh, m_top, :].set(rows)


def _prob_select(q, k, L_K, sample_k, n_top, sample_key):
    """_prob_QK index selection: random key sampling + sparsity-measure top-k."""
    L_Q = q.shape[1]
    # Same random sample indices for every (batch, head), like torch.randint.
    index_sample = jax.random.randint(sample_key, (L_Q, sample_k), 0, L_K)
    k_sample = q.dtype.type(0) + k[:, index_sample, :]            # (BH,L_Q,s,D)
    q_k_sample = jnp.einsum('bqd,bqsd->bqs', q, k_sample)
    M = jnp.max(q_k_sample, axis=-1) - jnp.sum(q_k_sample, axis=-1) / L_K
    _, m_top = lax.top_k(M, n_top)                                # (BH, n_top)
    q_reduce = jnp.take_along_axis(q, m_top[..., None], axis=1)   # (BH,n_top,D)
    return q_reduce, m_top


def prob_attention_forward(queries, keys, values, attn_mask=None, tau=None,
                           delta=None, *, factor=5, scale=None, mask_flag=True,
                           sample_key, compute_dtype=jnp.bfloat16,
                           use_pallas=True):
    """Matches ProbAttention.forward (output_attention=False; dropout is defined
    but unused in the reference forward).

    queries/keys/values: (B, L, H, D).  Returns (context (B, H, L_Q, D), None).
    attn_mask / tau / delta are accepted and ignored, as in the reference.
    """
    B, L_Q, H, D = queries.shape
    _, L_K, _, _ = keys.shape
    _, L_V, _, _ = values.shape
    BH = B * H

    q = jnp.transpose(queries, (0, 2, 1, 3)).reshape(BH, L_Q, D)
    k = jnp.transpose(keys, (0, 2, 1, 3)).reshape(BH, L_K, D)
    v = jnp.transpose(values, (0, 2, 1, 3)).reshape(BH, L_V, D)

    U_part = min(factor * int(math.ceil(math.log(L_K))), L_K)
    u = min(factor * int(math.ceil(math.log(L_Q))), L_Q)
    scale_val = scale if scale is not None else 1.0 / math.sqrt(D)
    if mask_flag:
        assert L_Q == L_V, "mask_flag=True requires L_Q == L_V"

    # Data-dependent sampling / gather / top-k: plain JAX glue.
    q_reduce, m_top = _prob_select(q, k, L_K, U_part, u, sample_key)

    # Fused hot path: attention of the u selected queries over all keys plus
    # the initial-context + scatter (Pallas).
    if use_pallas:
        context = prob_attn_context_pallas(
            q_reduce, k, v, m_top, scale_val, L_Q,
            mask_flag=mask_flag, compute_dtype=compute_dtype)
    else:
        context = _context_ref(q_reduce, k, v, m_top, scale_val, L_Q, mask_flag)

    return context.reshape(B, H, L_Q, D), None  # output_attention=False


# ----------------------------------- main --------------------------------------

if __name__ == "__main__":
    B, L, H, D = 2, 96, 4, 64
    factor = 5

    key = jax.random.PRNGKey(0)
    kq, kk, kv, ks = jax.random.split(key, 4)
    queries = jax.random.normal(kq, (B, L, H, D), jnp.float32)
    keys = jax.random.normal(kk, (B, L, H, D), jnp.float32)
    values = jax.random.normal(kv, (B, L, H, D), jnp.float32)

    # Correctness: f32 Pallas path (exact divide, no bf16 rounding) vs pure-JAX
    # reference, with identical sampled indices / top-u selection.
    out_f32, _ = prob_attention_forward(
        queries, keys, values, factor=factor, mask_flag=True,
        sample_key=ks, compute_dtype=jnp.float32)
    out_ref, _ = prob_attention_forward(
        queries, keys, values, factor=factor, mask_flag=True,
        sample_key=ks, use_pallas=False)
    jax.block_until_ready((out_f32, out_ref))
    assert out_f32.shape == (B, H, L, D), out_f32.shape
    max_err = float(jnp.max(jnp.abs(out_f32 - out_ref)))
    assert max_err < 1e-2, f"max abs err vs reference (masked): {max_err}"

    # Unmasked (cross-attention style) branch.
    out_nm, _ = prob_attention_forward(
        queries, keys, values, factor=factor, mask_flag=False,
        sample_key=ks, compute_dtype=jnp.float32)
    ref_nm, _ = prob_attention_forward(
        queries, keys, values, factor=factor, mask_flag=False,
        sample_key=ks, use_pallas=False)
    jax.block_until_ready((out_nm, ref_nm))
    max_err_nm = float(jnp.max(jnp.abs(out_nm - ref_nm)))
    assert max_err_nm < 1e-2, f"max abs err vs reference (unmasked): {max_err_nm}"

    # Production path: bf16 inputs in HBM, f32 softmax / accumulation, approx
    # reciprocal (rows sum to 1 within ~2^-12; output deviates at bf16 level).
    out, attn = prob_attention_forward(
        queries, keys, values, factor=factor, mask_flag=True,
        sample_key=ks, compute_dtype=jnp.bfloat16)
    jax.block_until_ready(out)
    assert out.shape == (B, H, L, D), out.shape
    assert attn is None
    assert bool(jnp.all(jnp.isfinite(out)))
    print("KERNEL_OK")
</pallas_src>

<mosaic_0001>
module attributes {stable_mosaic.version = 11 : i64} {
  func.func @_prob_attn_ctx_kernel(%arg0: i32, %arg1: memref<2x32x64xf32, #tpu.memory_space<vmem>>, %arg2: memref<2x96x64xf32, #tpu.memory_space<vmem>>, %arg3: memref<2x96x64xf32, #tpu.memory_space<vmem>>, %arg4: memref<2x32x1xi32, #tpu.memory_space<vmem>>, %arg5: memref<2x1x32xi32, #tpu.memory_space<vmem>>, %arg6: memref<2x96x64xf32, #tpu.memory_space<vmem>>) attributes {dimension_semantics = [#tpu.dimension_semantics<parallel>], iteration_bounds = array<i64: 4>, scalar_prefetch = 0 : i64, scratch_operands = 0 : i64, tpu.core_type = #tpu.core_type<tc>, window_params = [{transform_indices = @transform_0, window_bounds = array<i64: 2, 32, 64>}, {transform_indices = @transform_1, window_bounds = array<i64: 2, 96, 64>}, {transform_indices = @transform_2, window_bounds = array<i64: 2, 96, 64>}, {transform_indices = @transform_3, window_bounds = array<i64: 2, 32, 1>}, {transform_indices = @transform_4, window_bounds = array<i64: 2, 1, 32>}, {transform_indices = @transform_5, window_bounds = array<i64: 2, 96, 64>}]} {
    %c0 = arith.constant 0 : index
    %c0_0 = arith.constant 0 : index
    %c0_1 = arith.constant 0 : index
    %0 = vector.load %arg1[%c0, %c0_0, %c0_1] : memref<2x32x64xf32, #tpu.memory_space<vmem>>, vector<2x32x64xf32>
    %cst = arith.constant 1.250000e-01 : f32
    %1 = vector.broadcast %cst : f32 to vector<2x32x64xf32>
    %2 = arith.mulf %0, %1 : vector<2x32x64xf32>
    %c0_2 = arith.constant 0 : index
    %c0_3 = arith.constant 0 : index
    %c0_4 = arith.constant 0 : index
    %3 = vector.load %arg2[%c0_2, %c0_3, %c0_4] : memref<2x96x64xf32, #tpu.memory_space<vmem>>, vector<2x96x64xf32>
    %cst_5 = arith.constant dense<0.000000e+00> : vector<2x32x96xf32>
    %4 = tpu.matmul %2, %3, %cst_5 {dimension_numbers = #tpu.dot_dimension_numbers<[2], [2], [1], [1], [0, 0, 0, 1, 1, 1], [0], [0]>} : vector<2x32x64xf32>, vector<2x96x64xf32>, vector<2x32x96xf32> -> vector<2x32x96xf32>
    %5 = tpu.iota {dimensions = array<i32: 2>} : vector<2x32x96xi32>
    %c0_6 = arith.constant 0 : index
    %c0_7 = arith.constant 0 : index
    %c0_8 = arith.constant 0 : index
    %6 = vector.load %arg4[%c0_6, %c0_7, %c0_8] : memref<2x32x1xi32, #tpu.memory_space<vmem>>, vector<2x32x1xi32>
    %7 = vector.broadcast %6 : vector<2x32x1xi32> to vector<2x32x96xi32>
    %8 = arith.cmpi sgt, %5, %7 : vector<2x32x96xi32>
    %cst_9 = arith.constant -1.000000e+30 : f32
    %9 = vector.broadcast %cst_9 : f32 to vector<2x32x96xf32>
    %10 = arith.select %8, %9, %4 : vector<2x32x96xi1>, vector<2x32x96xf32>
    %cst_10 = arith.constant dense<0xFF800000> : vector<2x32xf32>
    %11 = vector.multi_reduction <maximumf>, %10, %cst_10 [2] : vector<2x32x96xf32> to vector<2x32xf32>
    %12 = vector.shape_cast %11 : vector<2x32xf32> to vector<2x32x1xf32>
    %13 = vector.broadcast %12 : vector<2x32x1xf32> to vector<2x32x96xf32>
    %14 = arith.subf %10, %13 : vector<2x32x96xf32>
    %15 = math.exp %14 : vector<2x32x96xf32>
    %cst_11 = arith.constant dense<0.000000e+00> : vector<2x32xf32>
    %16 = vector.multi_reduction <add>, %15, %cst_11 [2] : vector<2x32x96xf32> to vector<2x32xf32>
    %17 = vector.shape_cast %16 : vector<2x32xf32> to vector<2x32x1xf32>
    %18 = vector.broadcast %17 : vector<2x32x1xf32> to vector<2x32x96xf32>
    %19 = arith.divf %15, %18 : vector<2x32x96xf32>
    %c0_12 = arith.constant 0 : index
    %c0_13 = arith.constant 0 : index
    %c0_14 = arith.constant 0 : index
    %20 = vector.load %arg3[%c0_12, %c0_13, %c0_14] : memref<2x96x64xf32, #tpu.memory_space<vmem>>, vector<2x96x64xf32>
    %cst_15 = arith.constant dense<0.000000e+00> : vector<2x32x64xf32>
    %21 = tpu.matmul %19, %20, %cst_15 {dimension_numbers = #tpu.dot_dimension_numbers<[2], [1], [1], [2], [0, 0, 0, 1, 1, 2], [0], [0]>} : vector<2x32x96xf32>, vector<2x96x64xf32>, vector<2x32x64xf32> -> vector<2x32x64xf32>
    %c0_16 = arith.constant 0 : index
    %c0_17 = arith.constant 0 : index
    %c0_18 = arith.constant 0 : index
    %22 = vector.load %arg3[%c0_16, %c0_17, %c0_18] : memref<2x96x64xf32, #tpu.memory_space<vmem>>, vector<2x96x64xf32>
    %23 = tpu.iota {dimensions = array<i32: 0>} : vector<96x32xi32>
    %24 = tpu.iota {dimensions = array<i32: 0>} : vector<96x96xi32>
    %25 = tpu.iota {dimensions = array<i32: 1>} : vector<96x96xi32>
    %26 = arith.cmpi sle, %25, %24 : vector<96x96xi32>
    %27 = arith.extui %26 : vector<96x96xi1> to vector<96x96xi32>
    %28 = arith.sitofp %27 : vector<96x96xi32> to vector<96x96xf32>
    %29 = vector.extract_strided_slice %22 {offsets = [0, 0, 0], sizes = [1, 96, 64], strides = [1, 1, 1]} : vector<2x96x64xf32> to vector<1x96x64xf32>
    %30 = vector.shape_cast %29 : vector<1x96x64xf32> to vector<96x64xf32>
    %cst_19 = arith.constant dense<0.000000e+00> : vector<96x64xf32>
    %31 = tpu.matmul %28, %30, %cst_19 {dimension_numbers = #tpu.dot_dimension_numbers<[1], [0], [0], [1], [0, 0, 1, 1], [], []>} : vector<96x96xf32>, vector<96x64xf32>, vector<96x64xf32> -> vector<96x64xf32>
    %c0_20 = arith.constant 0 : index
    %c0_21 = arith.constant 0 : index
    %c0_22 = arith.constant 0 : index
    %32 = vector.load %arg5[%c0_20, %c0_21, %c0_22] : memref<2x1x32xi32, #tpu.memory_space<vmem>>, vector<1x1x32xi32>
    %33 = vector.shape_cast %32 : vector<1x1x32xi32> to vector<1x32xi32>
    %34 = vector.broadcast %33 : vector<1x32xi32> to vector<96x32xi32>
    %35 = arith.cmpi eq, %23, %34 : vector<96x32xi32>
    %36 = arith.extui %35 : vector<96x32xi1> to vector<96x32xi32>
    %37 = arith.sitofp %36 : vector<96x32xi32> to vector<96x32xf32>
    %38 = vector.extract_strided_slice %21 {offsets = [0, 0, 0], sizes = [1, 32, 64], strides = [1, 1, 1]} : vector<2x32x64xf32> to vector<1x32x64xf32>
    %39 = vector.shape_cast %38 : vector<1x32x64xf32> to vector<32x64xf32>
    %cst_23 = arith.constant dense<0.000000e+00> : vector<96x64xf32>
    %40 = tpu.matmul %37, %39, %cst_23 {dimension_numbers = #tpu.dot_dimension_numbers<[1], [0], [0], [1], [0, 0, 1, 1], [], []>} : vector<96x32xf32>, vector<32x64xf32>, vector<96x64xf32> -> vector<96x64xf32>
    %cst_24 = arith.constant dense<0xFF800000> : vector<96xf32>
    %41 = vector.multi_reduction <maximumf>, %37, %cst_24 [1] : vector<96x32xf32> to vector<96xf32>
    %42 = vector.shape_cast %41 : vector<96xf32> to vector<96x1xf32>
    %cst_25 = arith.constant 0.000000e+00 : f32
    %43 = vector.broadcast %cst_25 : f32 to vector<96x1xf32>
    %44 = arith.cmpf ogt, %42, %43 : vector<96x1xf32>
    %45 = vector.shape_cast %44 : vector<96x1xi1> to vector<96x1xi1>
    %46 = vector.broadcast %45 : vector<96x1xi1> to vector<96x64xi1>
    %47 = arith.select %46, %40, %31 : vector<96x64xi1>, vector<96x64xf32>
    %c0_26 = arith.constant 0 : index
    %c0_27 = arith.constant 0 : index
    %c0_28 = arith.constant 0 : index
    %48 = vector.load %arg6[%c0_26, %c0_27, %c0_28] : memref<2x96x64xf32, #tpu.memory_space<vmem>>, vector<1x96x64xf32>
    %49 = vector.shape_cast %48 : vector<1x96x64xf32> to vector<96x64xf32>
    %50 = vector.shape_cast %47 : vector<96x64xf32> to vector<1x96x64xf32>
    tpu.vector_store %arg6[%c0_26, %c0_27, %c0_28], %50 {strides = array<i32>} : memref<2x96x64xf32, #tpu.memory_space<vmem>>, vector<1x96x64xf32>,
    %51 = vector.extract_strided_slice %22 {offsets = [1, 0, 0], sizes = [1, 96, 64], strides = [1, 1, 1]} : vector<2x96x64xf32> to vector<1x96x64xf32>
    %52 = vector.shape_cast %51 : vector<1x96x64xf32> to vector<96x64xf32>
    %cst_29 = arith.constant dense<0.000000e+00> : vector<96x64xf32>
    %53 = tpu.matmul %28, %52, %cst_29 {dimension_numbers = #tpu.dot_dimension_numbers<[1], [0], [0], [1], [0, 0, 1, 1], [], []>} : vector<96x96xf32>, vector<96x64xf32>, vector<96x64xf32> -> vector<96x64xf32>
    %c1 = arith.constant 1 : index
    %c0_30 = arith.constant 0 : index
    %c0_31 = arith.constant 0 : index
    %54 = vector.load %arg5[%c1, %c0_30, %c0_31] : memref<2x1x32xi32, #tpu.memory_space<vmem>>, vector<1x1x32xi32>
    %55 = vector.shape_cast %54 : vector<1x1x32xi32> to vector<1x32xi32>
    %56 = vector.broadcast %55 : vector<1x32xi32> to vector<96x32xi32>
    %57 = arith.cmpi eq, %23, %56 : vector<96x32xi32>
    %58 = arith.extui %57 : vector<96x32xi1> to vector<96x32xi32>
    %59 = arith.sitofp %58 : vector<96x32xi32> to vector<96x32xf32>
    %60 = vector.extract_strided_slice %21 {offsets = [1, 0, 0], sizes = [1, 32, 64], strides = [1, 1, 1]} : vector<2x32x64xf32> to vector<1x32x64xf32>
    %61 = vector.shape_cast %60 : vector<1x32x64xf32> to vector<32x64xf32>
    %cst_32 = arith.constant dense<0.000000e+00> : vector<96x64xf32>
    %62 = tpu.matmul %59, %61, %cst_32 {dimension_numbers = #tpu.dot_dimension_numbers<[1], [0], [0], [1], [0, 0, 1, 1], [], []>} : vector<96x32xf32>, vector<32x64xf32>, vector<96x64xf32> -> vector<96x64xf32>
    %cst_33 = arith.constant dense<0xFF800000> : vector<96xf32>
    %63 = vector.multi_reduction <maximumf>, %59, %cst_33 [1] : vector<96x32xf32> to vector<96xf32>
    %64 = vector.shape_cast %63 : vector<96xf32> to vector<96x1xf32>
    %cst_34 = arith.constant 0.000000e+00 : f32
    %65 = vector.broadcast %cst_34 : f32 to vector<96x1xf32>
    %66 = arith.cmpf ogt, %64, %65 : vector<96x1xf32>
    %67 = vector.shape_cast %66 : vector<96x1xi1> to vector<96x1xi1>
    %68 = vector.broadcast %67 : vector<96x1xi1> to vector<96x64xi1>
    %69 = arith.select %68, %62, %53 : vector<96x64xi1>, vector<96x64xf32>
    %c1_35 = arith.constant 1 : index
    %c0_36 = arith.constant 0 : index
    %c0_37 = arith.constant 0 : index
    %70 = vector.load %arg6[%c1_35, %c0_36, %c0_37] : memref<2x96x64xf32, #tpu.memory_space<vmem>>, vector<1x96x64xf32>
    %71 = vector.shape_cast %70 : vector<1x96x64xf32> to vector<96x64xf32>
    %72 = vector.shape_cast %69 : vector<96x64xf32> to vector<1x96x64xf32>
    tpu.vector_store %arg6[%c1_35, %c0_36, %c0_37], %72 {strides = array<i32>} : memref<2x96x64xf32, #tpu.memory_space<vmem>>, vector<1x96x64xf32>,
    return
  }
  func.func @transform_0(%arg0: i32) -> (i32, i32, i32) {
    %c0_i32 = arith.constant 0 : i32
    %c0_i32_0 = arith.constant 0 : i32
    %c0_i32_1 = arith.constant 0 : i32
    return %arg0, %c0_i32, %c0_i32_0 : i32, i32, i32
  }
  func.func @transform_1(%arg0: i32) -> (i32, i32, i32) {
    %c0_i32 = arith.constant 0 : i32
    %c0_i32_0 = arith.constant 0 : i32
    %c0_i32_1 = arith.constant 0 : i32
    return %arg0, %c0_i32, %c0_i32_0 : i32, i32, i32
  }
  func.func @transform_2(%arg0: i32) -> (i32, i32, i32) {
    %c0_i32 = arith.constant 0 : i32
    %c0_i32_0 = arith.constant 0 : i32
    %c0_i32_1 = arith.constant 0 : i32
    return %arg0, %c0_i32, %c0_i32_0 : i32, i32, i32
  }
  func.func @transform_3(%arg0: i32) -> (i32, i32, i32) {
    %c0_i32 = arith.constant 0 : i32
    %c0_i32_0 = arith.constant 0 : i32
    %c0_i32_1 = arith.constant 0 : i32
    return %arg0, %c0_i32, %c0_i32_0 : i32, i32, i32
  }
  func.func @transform_4(%arg0: i32) -> (i32, i32, i32) {
    %c0_i32 = arith.constant 0 : i32
    %c0_i32_0 = arith.constant 0 : i32
    %c0_i32_1 = arith.constant 0 : i32
    return %arg0, %c0_i32, %c0_i32_0 : i32, i32, i32
  }
  func.func @transform_5(%arg0: i32) -> (i32, i32, i32) {
    %c0_i32 = arith.constant 0 : i32
    %c0_i32_0 = arith.constant 0 : i32
    %c0_i32_1 = arith.constant 0 : i32
    return %arg0, %c0_i32, %c0_i32_0 : i32, i32, i32
  }
}

</mosaic_0001>

<bundles_post_ra>
// kernel: tpu_custom_call.1
= control target key start
LH: loop header
LB: loop body
LE: loop exit
PB: predicated region body
PF: predicated region fallthrough
CT: control target
= control target key end

     0   :  { %s1877_s18 = smov 0   ;;  %s2560_s0 = inlined_call_operand.vmem [shape: f32[8,32,64], index: 0, kind: input, shape index: {}]   ;;  %s2561_s1 = inlined_call_operand.vmem [shape: f32[8,96,64], index: 1, kind: input, shape index: {}]   ;;  %s2562_s2 = inlined_call_operand.vmem [shape: f32[8,96,64], index: 2, kind: input, shape index: {}]   ;;  %s2563_s3 = inlined_call_operand.vmem [shape: s32[8,32,1], index: 3, kind: input, shape index: {}]   ;;  %s2564_s4 = inlined_call_operand.vmem [shape: s32[8,1,32], index: 4, kind: input, shape index: {}]   ;;  %s2565_s5 = inlined_call_operand.vmem [shape: f32[8,96,64], index: 5, kind: output, shape index: {}]  }
   0x1 LB: > { %s1614_s19 = sadd.s32 4294967295, %s1843_s18   ;;  %p1618_p0 = scmp.ge.s32.totalorder %s1843_s18, 1  ;;  %s1843_s18 = sphi %s1877_s18, %s15_s18  }
   0x2   : > { %p235_p1 = scmp.lt.s32.totalorder %s1843_s18, 5 }
   0x4   : > { %p236_p2 = pnand %p1618_p0, %p235_p1 }
   0x5   : > { %s1619_s20 = sshll.u32 (!%p236_p2), %s1614_s19, 1 }
   0x6   : > { %239 = sbr.rel (%p236_p2) target bundleno = 849 (0x351), region = 40  ;;  %p288_p3 = scmp.lt.s32.totalorder (!%p236_p2), %s1619_s20, 7 }
   0xb   : > { %s2569_s20 = smov (!%p288_p3, %s1619_s20), 7  ;;  %vm367_vm0 = vcmask 523264   ;;  %v1845_v6 = vmov 0   ;;  %v522_v50 = vlaneseq  ;;  %vm572_vm2 = vcmask 785408  }
   0xc   : > { %s1888_s21 = smul.u32 96, %s2569_s20  ;;  %s1771_s25 = sshll.u32 %s2569_s20, 5  ;;  %1800 = vset.pattern.permute.xlu0 %v1845_v6  ;;  %1801 = vset.pattern.permute.xlu1 %v1845_v6 }
   0xd   : > { %s1912_s28 = scalar_lea.vmem %s2563_s3, %s1771_s25  ;;  %1802 = vset.pattern.permute.xlu2 %v1845_v6  ;;  %s1956_s6 = scalar_lea.vmem %s2560_s0, %s1771_s25  ;;  %v1984_v52 = vand.u32 127, %v522_v50 }
   0xe   : > { %s1894_s24 = scalar_lea.vmem %s2561_s1, %s1888_s21  ;;  %v524_v7 = vld [vmem:[%s1912_s28] sm:$0xff]  ;;  %v525_v12 = vld [vmem:[%s1912_s28 + $0x8] sm:$0xff]  ;;  %v526_v17 = vld [vmem:[%s1912_s28 + $0x10] sm:$0xff]  ;;  %s2008_s9 = scalar_lea.vmem %s2562_s2, %s1888_s21 }
   0xf   : > { %v354_v0 = vld [vmem:[%s1894_s24 + $0x58] sm:$0xff]  ;;  %v353_v2 = vld [vmem:[%s1894_s24 + $0x50] sm:$0xff]  ;;  %v352_v4 = vld [vmem:[%s1894_s24 + $0x48] sm:$0xff]  ;;  %533 = vperm.xlu0 %1800, %v524_v7   ;;  %539 = vperm.xlu1 %1801, %v526_v17   ;;  %s2200_s12 = scalar_lea.vmem %s2564_s4, %s2569_s20  ;;  %s2494_s15 = scalar_lea.vmem %s2565_s5, %s1888_s21 }
  0x10   : > { %v366_v1 = vld [vmem:[%s1894_s24 + $0xb8] sm:$0xff]  ;;  %1632 = vmatpush.xpose.msk.msra.mxu0 %vm367_vm0, %v354_v0  ;;  %v365_v3 = vld [vmem:[%s1894_s24 + $0xb0] sm:$0xff]  ;;  %v364_v5 = vld [vmem:[%s1894_s24 + $0xa8] sm:$0xff] }
  0x11   : > { %1648 = vmatpush.xpose.msk.msra.mxu1 %vm367_vm0, %v366_v1  ;;  %v351_v8 = vld [vmem:[%s1894_s24 + $0x40] sm:$0xff]  ;;  %v350_v10 = vld [vmem:[%s1894_s24 + $0x38] sm:$0xff]  ;;  %v349_v13 = vld [vmem:[%s1894_s24 + $0x30] sm:$0xff] }
  0x12   : > { %v363_v9 = vld [vmem:[%s1894_s24 + $0xa0] sm:$0xff]  ;;  %v362_v11 = vld [vmem:[%s1894_s24 + $0x98] sm:$0xff]  ;;  %v361_v14 = vld [vmem:[%s1894_s24 + $0x90] sm:$0xff] }
  0x13   : > { %v348_v15 = vld [vmem:[%s1894_s24 + $0x28] sm:$0xff]  ;;  %v530_v18 = vld [vmem:[%s1912_s28 + $0x30] sm:$0xff]  ;;  %v347_v19 = vld [vmem:[%s1894_s24 + $0x20] sm:$0xff] }
  0x14   : > { %1633 = vmatpush.xpose.msk.msra.mxu0 %vm367_vm0, %v353_v2  ;;  %v360_v16 = vld [vmem:[%s1894_s24 + $0x88] sm:$0xff]  ;;  %v359_v20 = vld [vmem:[%s1894_s24 + $0x80] sm:$0xff]  ;;  %v346_v21 = vld [vmem:[%s1894_s24 + $0x18] sm:$0xff] }
  0x15   : > { %1649 = vmatpush.xpose.msk.msra.mxu1 %vm367_vm0, %v365_v3  ;;  %v358_v22 = vld [vmem:[%s1894_s24 + $0x78] sm:$0xff]  ;;  %v528_v23 = vld [vmem:[%s1912_s28 + $0x20] sm:$0xff]  ;;  %v345_v24 = vld [vmem:[%s1894_s24 + $0x10] sm:$0xff] }
  0x16   : > { %v357_v25 = vld [vmem:[%s1894_s24 + $0x70] sm:$0xff]  ;;  %v344_v26 = vld [vmem:[%s1894_s24 + $0x8] sm:$0xff]  ;;  %v527_v28 = vld [vmem:[%s1912_s28 + $0x18] sm:$0xff] }
  0x17   : > { %536 = vperm.xlu0 %1800, %v525_v12   ;;  %545 = vperm.xlu1 %1801, %v528_v23   ;;  %v356_v27 = vld [vmem:[%s1894_s24 + $0x68] sm:$0xff]  ;;  %v327_v29 = vld [vmem:[%s1956_s6] sm:$0xff]  ;;  %v531_v40 = vld [vmem:[%s1912_s28 + $0x38] sm:$0xff] }
  0x18   : > { %1634 = vmatpush.xpose.msk.msra.mxu0 %vm367_vm0, %v352_v4  ;;  %v331_v30 = vld [vmem:[%s1956_s6 + $0x20] sm:$0xff]  ;;  %542 = vperm.xlu2 %1802, %v527_v28   ;;  %v335_v33 = vmul.f32 0.125, %v327_v29  ;;  %v529_v35 = vld [vmem:[%s1912_s28 + $0x28] sm:$0xff]  ;;  %v329_v41 = vld [vmem:[%s1956_s6 + $0x10] sm:$0xff] }
  0x19   : > { %1650 = vmatpush.xpose.msk.msra.mxu1 %vm367_vm0, %v364_v5  ;;  %v343_v31 = vld [vmem:[%s1894_s24] sm:$0xff]  ;;  %v339_v34 = vmul.f32 0.125, %v331_v30  ;;  %v328_v36 = vld [vmem:[%s1956_s6 + $0x8] sm:$0xff]  ;;  %v333_v42 = vld [vmem:[%s1956_s6 + $0x30] sm:$0xff]  ;;  %v337_v43 = vmul.f32 0.125, %v329_v41 }
  0x1a   : > { %v355_v32 = vld [vmem:[%s1894_s24 + $0x60] sm:$0xff]  ;;  %v332_v37 = vld [vmem:[%s1956_s6 + $0x28] sm:$0xff]  ;;  %v336_v38 = vmul.f32 0.125, %v328_v36  ;;  %v341_v44 = vmul.f32 0.125, %v333_v42  ;;  %v330_v45 = vld [vmem:[%s1956_s6 + $0x18] sm:$0xff] }
  0x1b   : > { %v340_v39 = vmul.f32 0.125, %v332_v37  ;;  %v334_v46 = vld [vmem:[%s1956_s6 + $0x38] sm:$0xff]  ;;  %v338_v47 = vmul.f32 0.125, %v330_v45 }
  0x1c   : > { %1635 = vmatpush.xpose.msk.msra.mxu0 %vm367_vm0, %v351_v8  ;;  %v342_v48 = vmul.f32 0.125, %v334_v46  ;;  %v2013_v30 = vld [vmem:[%s2008_s9 + $0x58] sm:$0xff] }
  0x1d   : > { %1651 = vmatpush.xpose.msk.msra.mxu1 %vm367_vm0, %v363_v9  ;;  %805 = vmatpush.msra.mxu2 %v2013_v30 }
  0x1f   : > { %551 = vperm.xlu0 %1800, %v530_v18  }
  0x20   : > { %1636 = vmatpush.xpose.msk.msra.mxu0 %vm367_vm0, %v350_v10  ;;  %548 = vperm.xlu2 %1802, %v529_v35  }
  0x21   : > { %1652 = vmatpush.xpose.msk.msra.mxu1 %vm367_vm0, %v362_v11 }
  0x24   : > { %1637 = vmatpush.xpose.msk.msra.mxu0 %vm367_vm0, %v349_v13 }
  0x25   : > { %1653 = vmatpush.xpose.msk.msra.mxu1 %vm367_vm0, %v361_v14 }
  0x28   : > { %1638 = vmatpush.xpose.msk.msra.mxu0 %vm367_vm0, %v348_v15  ;;  %554 = vperm.xlu2 %1802, %v531_v40  }
  0x29   : > { %1654 = vmatpush.xpose.msk.msra.mxu1 %vm367_vm0, %v360_v16 }
  0x2c   : > { %1639 = vmatpush.xpose.msk.msra.mxu0 %vm367_vm0, %v347_v19 }
  0x2d   : > { %1655 = vmatpush.xpose.msk.msra.mxu1 %vm367_vm0, %v359_v20 }
  0x30   : > { %1640 = vmatpush.xpose.msk.msra.mxu0 %vm367_vm0, %v346_v21 }
  0x31   : > { %1656 = vmatpush.xpose.msk.msra.mxu1 %vm367_vm0, %v358_v22 }
  0x34   : > { %1641 = vmatpush.xpose.msk.msra.mxu0 %vm367_vm0, %v345_v24 }
  0x35   : > { %1657 = vmatpush.xpose.msk.msra.mxu1 %vm367_vm0, %v357_v25 }
  0x38   : > { %1642 = vmatpush.xpose.msk.msra.mxu0 %vm367_vm0, %v344_v26 }
  0x39   : > { %1658 = vmatpush.xpose.msk.msra.mxu1 %vm367_vm0, %v356_v27 }
  0x3c   : > { %1643 = vmatpush.xpose.msk.msra.mxu0 %vm367_vm0, %v343_v31  ;;  %v2016_v31 = vld [vmem:[%s2008_s9 + $0x50] sm:$0xff] }
  0x3d   : > { %1659 = vmatpush.xpose.msk.msra.mxu1 %vm367_vm0, %v355_v32  ;;  %806 = vmatpush.msra.mxu2 %v2016_v31 }
  0x3f   : > { %1644 = vmatmul.msk.f32.vlgmr.msra.gmra.mxu0 %vm367_vm0, %v335_v33 }
  0x40   : > { %1660 = vmatmul.msk.f32.vlgmr.msra.gmra.mxu1 %vm367_vm0, %v339_v34 }
  0x47   : > { %1645 = vmatmul.msk.f32.gmra.mxu0 %vm367_vm0, %v336_v38 }
  0x48   : > { %1661 = vmatmul.msk.f32.gmra.mxu1 %vm367_vm0, %v340_v39 }
  0x4f   : > { %1646 = vmatmul.msk.f32.gmra.mxu0 %vm367_vm0, %v337_v43 }
  0x50   : > { %1662 = vmatmul.msk.f32.gmra.mxu1 %vm367_vm0, %v341_v44 }
  0x57   : > { %1647 = vmatmul.msk.f32.gmra.mxu0 %vm367_vm0, %v338_v47 }
  0x58   : > { %1663 = vmatmul.msk.f32.gmra.mxu1 %vm367_vm0, %v342_v48 }
  0x72   : > { %v543_v53 = vpop.permute.xlu2 %542 }
  0x73   : > { %vm559_vm8 = vcmp.gt.s32.totalorder %v1984_v52, %v543_v53 }
  0x7a   : > { %v549_v1 = vpop.permute.xlu2 %548 }
  0x7b   : > { %vm561_vm5 = vcmp.gt.s32.totalorder %v1984_v52, %v549_v1  ;;  %v772_v1 = vld [vmem:[%s2008_s9 + $0x38] sm:$0xff] }
  0x81   : > { %v540_v49 = vpop.permute.xlu1 %539  ;;  %v534_v51 = vpop.permute.xlu0 %533 }
  0x82   : > { %vm556_vm1 = vcmp.gt.s32.totalorder %v1984_v52, %v534_v51  ;;  %vm558_vm6 = vcmp.gt.s32.totalorder %v1984_v52, %v540_v49  ;;  %v555_v15 = vpop.permute.xlu2 %554 }
  0x83   : > { %vm563_vm9 = vcmp.gt.s32.totalorder %v1984_v52, %v555_v15  ;;  %v765_v15 = vld [vmem:[%s2008_s9] sm:$0xff] }
  0x89   : > { %v546_v54 = vpop.permute.xlu1 %545  ;;  %v537_v59 = vpop.permute.xlu0 %536 }
  0x8a   : > { %vm560_vm3 = vcmp.gt.s32.totalorder %v1984_v52, %v546_v54  ;;  %vm557_vm4 = vcmp.gt.s32.totalorder %v1984_v52, %v537_v59 }
  0x91   : > { %v552_v3 = vpop.permute.xlu0 %551 }
  0x92   : > { %vm562_vm7 = vcmp.gt.s32.totalorder %v1984_v52, %v552_v3  ;;  %v771_v3 = vld [vmem:[%s2008_s9 + $0x30] sm:$0xff] }
  0xbc   : > { %v433_v55 = vpop.f32.mrf.mxu0 }
  0xbd   : > { %v510_v56 = vpop.f32.mrf.mxu1  ;;  %v564_v57 = vsel %vm556_vm1, -1e+30, %v433_v55 }
  0xbe   : > { %v573_v58 = vsel %vm572_vm2, %v564_v57, -inf  ;;  %v568_v60 = vsel %vm560_vm3, -1e+30, %v510_v56 }
  0xbf   : > { %574 = vmax.xlane.f32.xlu1 %v573_v58  ;;  %v585_v63 = vsel %vm572_vm2, %v568_v60, -inf }
  0xc4   : > { %v436_v61 = vpop.f32.mrf.mxu0 }
  0xc5   : > { %v513_v62 = vpop.f32.mrf.mxu1  ;;  %v565_v0 = vsel %vm557_vm4, -1e+30, %v436_v61 }
  0xc6   : > { %v576_v2 = vsel %vm572_vm2, %v565_v0, -inf  ;;  %v569_v4 = vsel %vm561_vm5, -1e+30, %v513_v62 }
  0xc7   : > { %586 = vmax.xlane.f32.xlu1 %v585_v63  ;;  %577 = vmax.xlane.f32.xlu0 %v576_v2  ;;  %v588_v7 = vsel %vm572_vm2, %v569_v4, -inf  ;;  %v774_v63 = vld [vmem:[%s2008_s9 + $0x48] sm:$0xff]  ;;  %v2052_v2 = vld [vmem:[%s2008_s9 + $0xb8] sm:$0xff] }
  0xc8   : > { %807 = vmatpush.msra.mxu2 %v774_v63  ;;  %846 = vmatpush.msra.mxu3 %v2052_v2 }
  0xc9   : > { %1237 = vmatpush.msrb.mxu0 %v2052_v2 }
  0xcc   : > { %v439_v5 = vpop.f32.mrf.mxu0 }
  0xcd   : > { %v516_v6 = vpop.f32.mrf.mxu1  ;;  %v566_v8 = vsel %vm558_vm6, -1e+30, %v439_v5  ;;  %v770_v5 = vld [vmem:[%s2008_s9 + $0x28] sm:$0xff] }
  0xce   : > { %v570_v9 = vsel %vm562_vm7, -1e+30, %v516_v6  ;;  %v579_v11 = vsel %vm572_vm2, %v566_v8, -inf  ;;  %v2063_v6 = vld [vmem:[%s2008_s9 + $0xa8] sm:$0xff] }
  0xcf   : > { %v591_v10 = vsel %vm572_vm2, %v570_v9, -inf  ;;  %589 = vmax.xlane.f32.xlu0 %v588_v7  ;;  %580 = vmax.xlane.f32.xlu2 %v579_v11  ;;  %v769_v7 = vld [vmem:[%s2008_s9 + $0x20] sm:$0xff]  ;;  %v767_v11 = vld [vmem:[%s2008_s9 + $0x10] sm:$0xff] }
  0xd0   : > { %592 = vmax.xlane.f32.xlu1 %v591_v10  ;;  %v2075_v10 = vld [vmem:[%s2008_s9 + $0x98] sm:$0xff] }
  0xd4   : > { %v442_v12 = vpop.f32.mrf.mxu0 }
  0xd5   : > { %v567_v13 = vsel %vm559_vm8, -1e+30, %v442_v12  ;;  %v519_v16 = vpop.f32.mrf.mxu1  ;;  %v2081_v12 = vld [vmem:[%s2008_s9 + $0x90] sm:$0xff] }
  0xd6   : > { %v582_v14 = vsel %vm572_vm2, %v567_v13, -inf  ;;  %v571_v17 = vsel %vm563_vm9, -1e+30, %v519_v16  ;;  %v2093_v16 = vld [vmem:[%s2008_s9 + $0x80] sm:$0xff] }
  0xd7   : > { %583 = vmax.xlane.f32.xlu2 %v582_v14  ;;  %v594_v18 = vsel %vm572_vm2, %v571_v17, -inf  ;;  %v2088_v14 = vld [vmem:[%s2008_s9 + $0x88] sm:$0xff] }
  0xdf   : > { %595 = vmax.xlane.f32.xlu2 %v594_v18  ;;  %v2104_v18 = vld [vmem:[%s2008_s9 + $0x70] sm:$0xff] }
 0x132   : > { %v575_v19 = vpop.xlane.xlu1 %574 }
 0x133   : > { %v597_v20 = vsub.f32 %v564_v57, %v575_v19  ;;  %v2110_v19 = vld [vmem:[%s2008_s9 + $0x68] sm:$0xff] }
 0x135   : > { %v605_v21 = vmul.f32 1.442695, %v597_v20  ;;  %v2115_v20 = vld [vmem:[%s2008_s9 + $0x60] sm:$0xff] }
 0x137   : > { %1805 = vpow2.f32 %v605_v21 }
 0x13a   : > { %v587_v22 = vpop.xlane.xlu1 %586  ;;  %v578_v23 = vpop.xlane.xlu0 %577 }
 0x13b   : > { %v601_v24 = vsub.f32 %v568_v60, %v587_v22  ;;  %v598_v25 = vsub.f32 %v565_v0, %v578_v23  ;;  %v773_v0 = vld [vmem:[%s2008_s9 + $0x40] sm:$0xff] }
 0x13c   : > { %808 = vmatpush.msra.mxu2 %v773_v0 }
 0x13d   : > { %v2002_v26 = vpop.eup %1805  ;;  %v613_v27 = vmul.f32 1.442695, %v601_v24  ;;  %v607_v28 = vmul.f32 1.442695, %v598_v25 }
 0x13e   : > { %v621_v29 = vsel %vm572_vm2, %v2002_v26, 0.0  ;;  %809 = vmatpush.msra.mxu2 %v772_v1 }
 0x13f   : > { %1807 = vpow2.f32 %v613_v27  ;;  %622 = vadd.xlane.f32.xlu0 %v621_v29 }
 0x140   : > { %1809 = vpow2.f32 %v607_v28  ;;  %810 = vmatpush.msra.mxu2 %v771_v3 }
 0x142   : > { %v581_v34 = vpop.xlane.xlu2 %580  ;;  %v590_v35 = vpop.xlane.xlu0 %589  ;;  %811 = vmatpush.msra.mxu2 %v770_v5 }
 0x143   : > { %v593_v32 = vpop.xlane.xlu1 %592  ;;  %v599_v36 = vsub.f32 %v566_v8, %v581_v34  ;;  %v602_v42 = vsub.f32 %v569_v4, %v590_v35  ;;  %v2057_v4 = vld [vmem:[%s2008_s9 + $0xb0] sm:$0xff]  ;;  %v2069_v8 = vld [vmem:[%s2008_s9 + $0xa0] sm:$0xff] }
 0x144   : > { %v603_v33 = vsub.f32 %v570_v9, %v593_v32  ;;  %847 = vmatpush.msra.mxu3 %v2057_v4  ;;  %1238 = vmatpush.msrb.mxu0 %v2057_v4  ;;  %v768_v9 = vld [vmem:[%s2008_s9 + $0x18] sm:$0xff] }
 0x145   : > { %v2020_v37 = vpop.eup %1807  ;;  %v609_v40 = vmul.f32 1.442695, %v599_v36  ;;  %v615_v44 = vmul.f32 1.442695, %v602_v42  ;;  %812 = vmatpush.msra.mxu2 %v769_v7 }
 0x146   : > { %v617_v38 = vmul.f32 1.442695, %v603_v33  ;;  %v2022_v39 = vpop.eup %1809  ;;  %v633_v41 = vsel %vm572_vm2, %v2020_v37, 0.0  ;;  %848 = vmatpush.msra.mxu3 %v2063_v6  ;;  %1239 = vmatpush.msrb.mxu0 %v2063_v6 }
 0x147   : > { %634 = vadd.xlane.f32.xlu0 %v633_v41  ;;  %v624_v43 = vsel %vm572_vm2, %v2022_v39, 0.0  ;;  %813 = vmatpush.msra.mxu2 %v768_v9 }
 0x148   : > { %1811 = vpow2.f32 %v617_v38  ;;  %625 = vadd.xlane.f32.xlu1 %v624_v43  ;;  %849 = vmatpush.msra.mxu3 %v2069_v8 }
 0x149   : > { %1813 = vpow2.f32 %v609_v40  ;;  %1240 = vmatpush.msrb.mxu0 %v2069_v8  ;;  %814 = vmatpush.msra.mxu2 %v767_v11 }
 0x14a   : > { %v584_v45 = vpop.xlane.xlu2 %583  ;;  %1815 = vpow2.f32 %v615_v44  ;;  %850 = vmatpush.msra.mxu3 %v2075_v10 }
 0x14b   : > { %v600_v46 = vsub.f32 %v567_v13, %v584_v45  ;;  %1241 = vmatpush.msrb.mxu0 %v2075_v10  ;;  %v766_v13 = vld [vmem:[%s2008_s9 + $0x8] sm:$0xff] }
 0x14c   : > { %851 = vmatpush.msra.mxu3 %v2081_v12  ;;  %815 = vmatpush.msra.mxu2 %v766_v13 }
 0x14d   : > { %v611_v48 = vmul.f32 1.442695, %v600_v46  ;;  %1242 = vmatpush.msrb.mxu0 %v2081_v12 }
 0x14e   : > { %v2028_v47 = vpop.eup %1811  ;;  %852 = vmatpush.msra.mxu3 %v2088_v14  ;;  %816 = vmatpush.msra.mxu2 %v765_v15 }
 0x14f   : > { %v639_v49 = vsel %vm572_vm2, %v2028_v47, 0.0  ;;  %v2032_v51 = vpop.eup %1813  ;;  %1817 = vpow2.f32 %v611_v48  ;;  %1243 = vmatpush.msrb.mxu0 %v2088_v14 }
 0x150   : > { %640 = vadd.xlane.f32.xlu0 %v639_v49  ;;  %v627_v53 = vsel %vm572_vm2, %v2032_v51, 0.0  ;;  %v2036_v56 = vpop.eup %1815  ;;  %853 = vmatpush.msra.mxu3 %v2093_v16 }
 0x151   : > { %628 = vadd.xlane.f32.xlu2 %v627_v53  ;;  %v636_v60 = vsel %vm572_vm2, %v2036_v56, 0.0  ;;  %960 = vmatpush.msrb.mxu2 %v2013_v30 }
 0x152   : > { %v596_v54 = vpop.xlane.xlu2 %595  ;;  %1244 = vmatpush.msrb.mxu0 %v2093_v16 }
 0x153   : > { %v604_v55 = vsub.f32 %v571_v17, %v596_v54  ;;  %v2098_v17 = vld [vmem:[%s2008_s9 + $0x78] sm:$0xff]  ;;  %961 = vmatpush.msrb.mxu2 %v2016_v31 }
 0x154   : > { %854 = vmatpush.msra.mxu3 %v2098_v17  ;;  %1245 = vmatpush.msrb.mxu0 %v2098_v17 }
 0x155   : > { %v2038_v57 = vpop.eup %1817  ;;  %v619_v58 = vmul.f32 1.442695, %v604_v55  ;;  %962 = vmatpush.msrb.mxu2 %v774_v63 }
 0x156   : > { %v630_v59 = vsel %vm572_vm2, %v2038_v57, 0.0  ;;  %855 = vmatpush.msra.mxu3 %v2104_v18  ;;  %1246 = vmatpush.msrb.mxu0 %v2104_v18 }
 0x157   : > { %1819 = vpow2.f32 %v619_v58  ;;  %631 = vadd.xlane.f32.xlu1 %v630_v59  ;;  %963 = vmatpush.msrb.mxu2 %v773_v0 }
 0x158   : > { %856 = vmatpush.msra.mxu3 %v2110_v19  ;;  %1247 = vmatpush.msrb.mxu0 %v2110_v19 }
 0x159   : > { %637 = vadd.xlane.f32.xlu2 %v636_v60  ;;  %964 = vmatpush.msrb.mxu2 %v772_v1 }
 0x15a   : > { %857 = vmatpush.msra.mxu3 %v2115_v20  ;;  %1248 = vmatpush.msrb.mxu0 %v2115_v20 }
 0x15b   : > { %965 = vmatpush.msrb.mxu2 %v771_v3 }
 0x15d   : > { %v2044_v61 = vpop.eup %1819  ;;  %966 = vmatpush.msrb.mxu2 %v770_v5 }
 0x15e   : > { %v642_v62 = vsel %vm572_vm2, %v2044_v61, 0.0 }
 0x15f   : > { %643 = vadd.xlane.f32.xlu1 %v642_v62  ;;  %967 = vmatpush.msrb.mxu2 %v769_v7 }
 0x161   : > { %968 = vmatpush.msrb.mxu2 %v768_v9 }
 0x163   : > { %969 = vmatpush.msrb.mxu2 %v767_v11 }
 0x165   : > { %970 = vmatpush.msrb.mxu2 %v766_v13 }
 0x167   : > { %971 = vmatpush.msrb.mxu2 %v765_v15 }
 0x1b2   : > { %v623_v21 = vpop.xlane.xlu0 %622 }
 0x1b3   : > { %1821 = vrcp.f32 %v623_v21  ;;  %v656_v29 = vand.u32 2147483648, %v623_v21  ;;  %v654_v30 = vand.u32 2147483647, %v623_v21  ;;  %vm650_vm11 = vweird.f32 %v623_v21 }
 0x1b5   : > { %v657_v34 = vor.u32 1.1754944e-38, %v656_v29  ;;  %vm655_vm13 = vcmp.eq.f32.partialorder %v654_v30, 8.507059e+37 }
 0x1b9   : > { %v1822_v22 = vpop.eup %1821 }
 0x1ba   : > { %v646_v23 = vmul.f32 %v1822_v22, %v623_v21  ;;  %v635_v24 = vpop.xlane.xlu0 %634  ;;  %vm651_vm10 = vweird.f32 %v1822_v22 }
 0x1bb   : > { %v626_v25 = vpop.xlane.xlu1 %625  ;;  %1823 = vrcp.f32 %v635_v24  ;;  %vm652_vm12 = vmor %vm650_vm11, %vm651_vm10  ;;  %v716_v45 = vand.u32 2147483648, %v635_v24  ;;  %v714_v49 = vand.u32 2147483647, %v635_v24  ;;  %vm710_vm1 = vweird.f32 %v635_v24 }
 0x1bc   : > { %v647_v27 = vsub.f32 1.0, %v646_v23  ;;  %1825 = vrcp.f32 %v626_v25  ;;  %v671_v54 = vand.u32 2147483648, %v626_v25  ;;  %vm665_vm3 = vweird.f32 %v626_v25 }
 0x1bd   : > { %v717_v58 = vor.u32 1.1754944e-38, %v716_v45  ;;  %v669_v60 = vand.u32 2147483647, %v626_v25  ;;  %vm715_vm6 = vcmp.eq.f32.partialorder %v714_v49, 8.507059e+37 }
 0x1be   : > { %v648_v28 = vmul.f32 %v1822_v22, %v647_v27  ;;  %v672_v5 = vor.u32 1.1754944e-38, %v671_v54 }
 0x1bf   : > { %vm670_vm7 = vcmp.eq.f32.partialorder %v669_v60, 8.507059e+37 }
 0x1c0   : > { %v649_v31 = vadd.f32 %v1822_v22, %v648_v28 }
 0x1c1   : > { %v1824_v32 = vpop.eup %1823 }
 0x1c2   : > { %v1826_v33 = vpop.eup %1825  ;;  %v706_v35 = vmul.f32 %v1824_v32, %v635_v24  ;;  %v653_v36 = vsel %vm652_vm12, %v1822_v22, %v649_v31  ;;  %vm711_vm14 = vweird.f32 %v1824_v32 }
 0x1c3   : > { %v661_v38 = vmul.f32 %v1826_v33, %v626_v25  ;;  %v2120_v41 = vpop.xlane.xlu0 %640  ;;  %v658_v43 = vsel %vm655_vm13, %v657_v34, %v653_v36  ;;  %vm666_vm15 = vweird.f32 %v1826_v33  ;;  %vm712_vm4 = vmor %vm710_vm1, %vm711_vm14 }
 0x1c4   : > { %v707_v40 = vsub.f32 1.0, %v706_v35  ;;  %v2122_v42 = vpop.xlane.xlu2 %628  ;;  %v659_v48 = vmul.f32 %v2002_v26, %v658_v43  ;;  %vm2129_vm5 = vmor %vm665_vm3, %vm666_vm15  ;;  %v746_v54 = vand.u32 2147483648, %v2120_v41  ;;  %v744_v60 = vand.u32 2147483647, %v2120_v41 }
 0x1c5   : > { %v662_v44 = vsub.f32 1.0, %v661_v38  ;;  %1827 = vrcp.f32 %v2122_v42  ;;  %v686_v23 = vand.u32 2147483648, %v2122_v42  ;;  %vm680_vm9 = vweird.f32 %v2122_v42 }
 0x1c6   : > { %v708_v46 = vmul.f32 %v1824_v32, %v707_v40  ;;  %1829 = vrcp.f32 %v2120_v41  ;;  %1664 = vmatmul.msk.f32.vlgmr.msra.gmra.mxu2 %vm572_vm2, %v659_v48 }
 0x1c7   : > { %v663_v53 = vmul.f32 %v1826_v33, %v662_v44  ;;  %1773 = vmatpush.msra.mxu2 %v2052_v2  ;;  %v687_v28 = vor.u32 1.1754944e-38, %v686_v23 }
 0x1c8   : > { %v709_v55 = vadd.f32 %v1824_v32, %v708_v46 }
 0x1c9   : > { %v664_v59 = vadd.f32 %v1826_v33, %v663_v53  ;;  %1774 = vmatpush.msra.mxu2 %v2057_v4 }
 0x1ca   : > { %v713_v62 = vsel %vm712_vm4, %v1824_v32, %v709_v55  ;;  %v2133_v0 = vpop.xlane.xlu1 %631 }
 0x1cb   : > { %v1828_v63 = vpop.eup %1827  ;;  %v668_v1 = vsel %vm2129_vm5, %v1826_v33, %v664_v59  ;;  %v718_v3 = vsel %vm715_vm6, %v717_v58, %v713_v62  ;;  %1831 = vrcp.f32 %v2133_v0  ;;  %1775 = vmatpush.msra.mxu2 %v2063_v6  ;;  %v684_v6 = vand.u32 2147483647, %v2122_v42 }
 0x1cc   : > { %v676_v7 = vmul.f32 %v1828_v63, %v2122_v42  ;;  %v2140_v2 = vpop.xlane.xlu2 %637  ;;  %v2142_v9 = vpop.eup %1829  ;;  %v673_v13 = vsel %vm670_vm7, %v672_v5, %v668_v1  ;;  %v719_v15 = vmul.f32 %v2020_v37, %v718_v3  ;;  %vm681_vm8 = vweird.f32 %v1828_v63  ;;  %v2209_v5 = vld [vmem:[%s2200_s12] ss:$0 sm:$0xff] }
 0x1cd   : > { %1833 = vrcp.f32 %v2140_v2  ;;  %v674_v4 = vmul.f32 %v2022_v39, %v673_v13  ;;  %1776 = vmatpush.msra.mxu2 %v2069_v8  ;;  %v736_v21 = vmul.f32 %v2142_v9, %v2120_v41  ;;  %vm682_vm10 = vmor %vm680_vm9, %vm681_vm8  ;;  %vm685_vm11 = vcmp.eq.f32.partialorder %v684_v6, 8.507059e+37 }
 0x1ce   : > { %v677_v11 = vsub.f32 1.0, %v676_v7  ;;  %1668 = vmatmul.msk.f32.vlgmr.msra.gmra.mxu3 %vm572_vm2, %v719_v15  ;;  %v731_v33 = vand.u32 2147483648, %v2140_v2  ;;  %v699_v38 = vand.u32 2147483647, %v2133_v0  ;;  %v729_v42 = vand.u32 2147483647, %v2140_v2 }
 0x1cf   : > { %1665 = vmatmul.msk.f32.gmra.mxu2 %vm572_vm2, %v674_v4  ;;  %v737_v27 = vsub.f32 1.0, %v736_v21  ;;  %vm695_vm14 = vweird.f32 %v2133_v0  ;;  %vm725_vm15 = vweird.f32 %v2140_v2  ;;  %vm741_vm3 = vweird.f32 %v2142_v9 }
 0x1d0   : > { %v678_v22 = vmul.f32 %v1828_v63, %v677_v11  ;;  %1777 = vmatpush.msra.mxu2 %v2075_v10  ;;  %v701_v10 = vand.u32 2147483648, %v2133_v0  ;;  %v732_v45 = vor.u32 1.1754944e-38, %v731_v33  ;;  %vm700_vm4 = vcmp.eq.f32.partialorder %v699_v38, 8.507059e+37 }
 0x1d1   : > { %v1832_v24 = vpop.eup %1831  ;;  %v738_v40 = vmul.f32 %v2142_v9, %v737_v27  ;;  %vm730_vm6 = vcmp.eq.f32.partialorder %v729_v42, 8.507059e+37  ;;  %vm740_vm7 = vweird.f32 %v2120_v41  ;;  %vm745_vm9 = vcmp.eq.f32.partialorder %v744_v60, 8.507059e+37 }
 0x1d2   : > { %v679_v25 = vadd.f32 %v1828_v63, %v678_v22  ;;  %v691_v39 = vmul.f32 %v1832_v24, %v2133_v0  ;;  %v2158_v8 = vpop.xlane.xlu1 %643  ;;  %1778 = vmatpush.msra.mxu2 %v2081_v12  ;;  %vm696_vm12 = vweird.f32 %v1832_v24  ;;  %v702_v44 = vor.u32 1.1754944e-38, %v701_v10  ;;  %vm742_vm8 = vmor %vm740_vm7, %vm741_vm3 }
 0x1d3   : > { %v1834_v37 = vpop.eup %1833  ;;  %1835 = vrcp.f32 %v2158_v8  ;;  %vm697_vm1 = vmor %vm695_vm14, %vm696_vm12  ;;  %v739_v53 = vadd.f32 %v2142_v9, %v738_v40 }
 0x1d4   : > { %v721_v29 = vmul.f32 %v1834_v37, %v2140_v2  ;;  %v692_v30 = vsub.f32 1.0, %v691_v39  ;;  %v683_v31 = vsel %vm682_vm10, %v1828_v63, %v679_v25  ;;  %1779 = vmatpush.msra.mxu2 %v2088_v14  ;;  %vm726_vm13 = vweird.f32 %v1834_v37 }
 0x1d5   : > { %v688_v34 = vsel %vm685_vm11, %v687_v28, %v683_v31  ;;  %vm727_vm5 = vmor %vm725_vm15, %vm726_vm13  ;;  %vm755_vm11 = vweird.f32 %v2158_v8  ;;  %v759_v63 = vand.u32 2147483647, %v2158_v8  ;;  %v1846_v2 = vmov 0.0  }
 0x1d6   : > { %v722_v32 = vsub.f32 1.0, %v721_v29  ;;  %v693_v35 = vmul.f32 %v1832_v24, %v692_v30  ;;  %v689_v36 = vmul.f32 %v2032_v51, %v688_v34  ;;  %1780 = vmatpush.msra.mxu2 %v2093_v16 }
 0x1d7   : > { %vm760_vm13 = vcmp.eq.f32.partialorder %v759_v63, 8.507059e+37 }
 0x1d8   : > { %v723_v12 = vmul.f32 %v1834_v37, %v722_v32  ;;  %1666 = vmatmul.msk.f32.gmra.mxu2 %vm572_vm2, %v689_v36  ;;  %v694_v43 = vadd.f32 %v1832_v24, %v693_v35 }
 0x1d9   : > { %v1836_v14 = vpop.eup %1835  ;;  %1781 = vmatpush.msra.mxu2 %v2098_v17 }
 0x1da   : > { %v724_v51 = vadd.f32 %v1834_v37, %v723_v12  ;;  %v751_v46 = vmul.f32 %v1836_v14, %v2158_v8  ;;  %v698_v48 = vsel %vm697_vm1, %v1832_v24, %v694_v43  ;;  %vm756_vm10 = vweird.f32 %v1836_v14 }
 0x1db   : > { %v703_v16 = vsel %vm700_vm4, %v702_v44, %v698_v48  ;;  %1782 = vmatpush.msra.mxu2 %v2104_v18  ;;  %v743_v18 = vsel %vm742_vm8, %v2142_v9, %v739_v53  ;;  %vm757_vm12 = vmor %vm755_vm11, %vm756_vm10  ;;  %vm1047_vm1 = vcmask 261120  }
 0x1dc   : > { %v728_v49 = vsel %vm727_vm5, %v1834_v37, %v724_v51  ;;  %v752_v55 = vsub.f32 1.0, %v751_v46  ;;  %v704_v58 = vmul.f32 %v2038_v57, %v703_v16  ;;  %v747_v57 = vor.u32 1.1754944e-38, %v746_v54 }
 0x1dd   : > { %v733_v17 = vsel %vm730_vm6, %v732_v45, %v728_v49  ;;  %1783 = vmatpush.msra.mxu2 %v2110_v19  ;;  %v761_v19 = vand.u32 2147483648, %v2158_v8 }
 0x1de   : > { %v734_v59 = vmul.f32 %v2036_v56, %v733_v17  ;;  %v753_v26 = vmul.f32 %v1836_v14, %v752_v55  ;;  %v748_v56 = vsel %vm745_vm9, %v747_v57, %v743_v18 }
 0x1df   : > { %1784 = vmatpush.msra.mxu2 %v2115_v20  ;;  %v749_v41 = vmul.f32 %v2028_v47, %v748_v56  ;;  %v762_v0 = vor.u32 1.1754944e-38, %v761_v19  ;;  %v2206_v47 = vshrl.u32 %v522_v50, 7 }
 0x1e0   : > { %1669 = vmatmul.msk.f32.gmra.mxu3 %vm572_vm2, %v734_v59  ;;  %1667 = vmatmul.msk.f32.gmra.mxu2 %vm572_vm2, %v704_v58  ;;  %v754_v62 = vadd.f32 %v1836_v14, %v753_v26 }
 0x1e1   : > { %vm1011_vm14 = vcmp.eq.s32.totalorder %v2206_v47, %v2209_v5  ;;  %vm884_vm15 = vcmp.le.s32.totalorder %v1984_v52, %v2206_v47  ;;  %v2226_v11 = vadd.s32 8, %v2206_v47  ;;  %v2229_v13 = vadd.s32 24, %v2206_v47 }
 0x1e2   : > { %v758_v20 = vsel %vm757_vm12, %v1836_v14, %v754_v62  ;;  %v2218_v9 = vsel %vm1011_vm14, 1.0, %v1846_v2  ;;  %v2251_v24 = vadd.s32 16, %v2206_v47  ;;  %v2254_v25 = vadd.s32 32, %v2206_v47  ;;  %v2315_v14 = vld [vmem:[%s2200_s12 + $0x1] ss:$0 sm:$0xff] }
 0x1e3   : > { %v763_v1 = vsel %vm760_vm13, %v762_v0, %v758_v20  ;;  %v1137_v50 = vsel %vm1047_vm1, %v2218_v9, -inf  ;;  %vm1012_vm3 = vcmp.eq.s32.totalorder %v2226_v11, %v2209_v5  ;;  %vm1014_vm4 = vcmp.eq.s32.totalorder %v2229_v13, %v2209_v5 }
 0x1e4   : > { %v764_v3 = vmul.f32 %v2044_v61, %v763_v1  ;;  %v1672_v61 = vsel %vm884_vm15, 1.0, %v1846_v2  ;;  %1138 = vmax.xlane.f32.xlu2 %v1137_v50  ;;  %vm885_vm5 = vcmp.le.s32.totalorder %v1984_v52, %v2226_v11  ;;  %v2238_v15 = vsel %vm1012_vm3, 1.0, %v1846_v2 }
 0x1e5   : > { %1720 = vmatmul.msk.f32.vlgmr.msrb.gmra.mxu0 %vm572_vm2, %v1672_v61  ;;  %v2241_v4 = vsel %vm1014_vm4, 1.0, %v1846_v2  ;;  %v1673_v22 = vsel %vm885_vm5, 1.0, %v1846_v2  ;;  %v1140_v23 = vsel %vm1047_vm1, %v2238_v15, -inf  ;;  %v2257_v37 = vadd.s32 48, %v2206_v47 }
 0x1e6   : > { %v1146_v6 = vsel %vm1047_vm1, %v2241_v4, -inf  ;;  %1141 = vmax.xlane.f32.xlu0 %v1140_v23  ;;  %vm1013_vm6 = vcmp.eq.s32.totalorder %v2251_v24, %v2209_v5  ;;  %vm1015_vm7 = vcmp.eq.s32.totalorder %v2254_v25, %v2209_v5  ;;  %vm886_vm9 = vcmp.le.s32.totalorder %v1984_v52, %v2251_v24 }
 0x1e7   : > { %vm1017_vm8 = vcmp.eq.s32.totalorder %v2257_v37, %v2209_v5  ;;  %v2270_v8 = vsel %vm1013_vm6, 1.0, %v1846_v2  ;;  %v2273_v27 = vsel %vm1015_vm7, 1.0, %v1846_v2  ;;  %v1674_v30 = vsel %vm886_vm9, 1.0, %v1846_v2 }
 0x1e8   : > { %1670 = vmatmul.msk.f32.gmra.mxu3 %vm572_vm2, %v749_v41  ;;  %1684 = vmatmul.msk.f32.vlgmr.msrb.gmra.mxu2 %vm572_vm2, %v1672_v61  ;;  %v2276_v28 = vsel %vm1017_vm8, 1.0, %v1846_v2  ;;  %v1149_v31 = vsel %vm1047_vm1, %v2273_v27, -inf  ;;  %v1143_v32 = vsel %vm1047_vm1, %v2270_v8, -inf  ;;  %vm887_vm10 = vcmp.le.s32.totalorder %v1984_v52, %v2229_v13 }
 0x1e9   : > { %v1155_v10 = vsel %vm1047_vm1, %v2276_v28, -inf  ;;  %1144 = vmax.xlane.f32.xlu1 %v1143_v32  ;;  %v2290_v33 = vadd.s32 40, %v2206_v47  ;;  %v2293_v34 = vadd.s32 56, %v2206_v47  ;;  %v2296_v35 = vadd.s32 72, %v2206_v47 }
 0x1ea   : > { %v1675_v36 = vsel %vm887_vm10, 1.0, %v1846_v2  ;;  %vm888_vm14 = vcmp.le.s32.totalorder %v1984_v52, %v2254_v25  ;;  %vm1289_vm15 = vcmp.eq.s32.totalorder %v2206_v47, %v2315_v14  ;;  %v2329_v46 = vadd.s32 80, %v2206_v47 }
 0x1eb   : > { %vm1016_vm11 = vcmp.eq.s32.totalorder %v2290_v33, %v2209_v5  ;;  %vm1018_vm12 = vcmp.eq.s32.totalorder %v2293_v34, %v2209_v5  ;;  %vm1020_vm13 = vcmp.eq.s32.totalorder %v2296_v35, %v2209_v5  ;;  %v2332_v48 = vadd.s32 64, %v2206_v47 }
 0x1ec   : > { %1147 = vmax.xlane.f32.xlu2 %v1146_v6  ;;  %v2306_v40 = vsel %vm1016_vm11, 1.0, %v1846_v2  ;;  %v2309_v12 = vsel %vm1018_vm12, 1.0, %v1846_v2  ;;  %v2312_v42 = vsel %vm1020_vm13, 1.0, %v1846_v2  ;;  %v1676_v16 = vsel %vm888_vm14, 1.0, %v1846_v2 }
 0x1ed   : > { %1721 = vmatmul.msk.f32.gmra.mxu0 %vm572_vm2, %v1673_v22  ;;  %v1158_v44 = vsel %vm1047_vm1, %v2309_v12, -inf  ;;  %v1164_v51 = vsel %vm1047_vm1, %v2312_v42, -inf  ;;  %v1152_v45 = vsel %vm1047_vm1, %v2306_v40, -inf  ;;  %vm1021_vm3 = vcmp.eq.s32.totalorder %v2329_v46, %v2209_v5 }
 0x1ee   : > { %1150 = vmax.xlane.f32.xlu0 %v1149_v31  ;;  %vm1019_vm4 = vcmp.eq.s32.totalorder %v2332_v48, %v2209_v5  ;;  %v1733_v53 = vsel %vm1289_vm15, 1.0, %v1846_v2  ;;  %v2343_v54 = vsel %vm1021_vm3, 1.0, %v1846_v2  ;;  %vm889_vm5 = vcmp.le.s32.totalorder %v1984_v52, %v2290_v33 }
 0x1ef   : > { %v2346_v55 = vsel %vm1019_vm4, 1.0, %v1846_v2  ;;  %v1167_v58 = vsel %vm1047_vm1, %v2343_v54, -inf  ;;  %v1414_v17 = vsel %vm1047_vm1, %v1733_v53, -inf  ;;  %vm1290_vm6 = vcmp.eq.s32.totalorder %v2226_v11, %v2315_v14 }
 0x1f0   : > { %1671 = vmatmul.msk.f32.gmra.mxu3 %vm572_vm2, %v764_v3  ;;  %1685 = vmatmul.msk.f32.gmra.mxu2 %vm572_vm2, %v1673_v22  ;;  %v1161_v59 = vsel %vm1047_vm1, %v2346_v55, -inf  ;;  %v2361_v60 = vadd.s32 88, %v2206_v47  ;;  %v1677_v26 = vsel %vm889_vm5, 1.0, %v1846_v2  ;;  %v1734_v57 = vsel %vm1290_vm6, 1.0, %v1846_v2 }
 0x1f1   : > { %1153 = vmax.xlane.f32.xlu1 %v1152_v45  ;;  %v1417_v62 = vsel %vm1047_vm1, %v1734_v57, -inf  ;;  %vm890_vm8 = vcmp.le.s32.totalorder %v1984_v52, %v2257_v37  ;;  %vm1291_vm9 = vcmp.eq.s32.totalorder %v2251_v24, %v2315_v14  ;;  %vm891_vm10 = vcmp.le.s32.totalorder %v1984_v52, %v2293_v34 }
 0x1f2   : > { %vm1022_vm7 = vcmp.eq.s32.totalorder %v2361_v60, %v2209_v5  ;;  %v1678_v41 = vsel %vm890_vm8, 1.0, %v1846_v2  ;;  %v1735_v63 = vsel %vm1291_vm9, 1.0, %v1846_v2  ;;  %vm1292_vm11 = vcmp.eq.s32.totalorder %v2229_v13, %v2315_v14 }
 0x1f3   : > { %v2369_v56 = vsel %vm1022_vm7, 1.0, %v1846_v2  ;;  %v1420_v20 = vsel %vm1047_vm1, %v1735_v63, -inf  ;;  %v1679_v0 = vsel %vm891_vm10, 1.0, %v1846_v2  ;;  %v1736_v1 = vsel %vm1292_vm11, 1.0, %v1846_v2 }
 0x1f4   : > { %1156 = vmax.xlane.f32.xlu2 %v1155_v10  ;;  %v1170_v19 = vsel %vm1047_vm1, %v2369_v56, -inf  ;;  %v1423_v3 = vsel %vm1047_vm1, %v1736_v1, -inf  ;;  %vm892_vm12 = vcmp.le.s32.totalorder %v1984_v52, %v2332_v48  ;;  %vm1293_vm13 = vcmp.eq.s32.totalorder %v2254_v25, %v2315_v14 }
 0x1f5   : > { %1722 = vmatmul.msk.f32.gmra.mxu0 %vm572_vm2, %v1674_v30  ;;  %v1680_v47 = vsel %vm892_vm12, 1.0, %v1846_v2  ;;  %v1737_v5 = vsel %vm1293_vm13, 1.0, %v1846_v2  ;;  %vm893_vm14 = vcmp.le.s32.totalorder %v1984_v52, %v2296_v35  ;;  %vm1294_vm15 = vcmp.eq.s32.totalorder %v2290_v33, %v2315_v14 }
 0x1f6   : > { %1159 = vmax.xlane.f32.xlu0 %v1158_v44  ;;  %v1738_v61 = vsel %vm1294_vm15, 1.0, %v1846_v2  ;;  %vm894_vm3 = vcmp.le.s32.totalorder %v1984_v52, %v2329_v46  ;;  %vm1295_vm4 = vcmp.eq.s32.totalorder %v2257_v37, %v2315_v14  ;;  %vm895_vm5 = vcmp.le.s32.totalorder %v1984_v52, %v2361_v60 }
 0x1f7   : > { %v1429_v50 = vsel %vm1047_vm1, %v1738_v61, -inf  ;;  %v1682_v11 = vsel %vm894_vm3, 1.0, %v1846_v2  ;;  %v1739_v13 = vsel %vm1295_vm4, 1.0, %v1846_v2  ;;  %vm1296_vm6 = vcmp.eq.s32.totalorder %v2293_v34, %v2315_v14 }
 0x1f8   : > { %1686 = vmatmul.msk.f32.gmra.mxu2 %vm572_vm2, %v1674_v30  ;;  %vm1297_vm7 = vcmp.eq.s32.totalorder %v2332_v48, %v2315_v14  ;;  %vm1298_vm8 = vcmp.eq.s32.totalorder %v2296_v35, %v2315_v14  ;;  %vm1300_vm9 = vcmp.eq.s32.totalorder %v2361_v60, %v2315_v14  ;;  %vm1299_vm10 = vcmp.eq.s32.totalorder %v2329_v46, %v2315_v14 }
 0x1f9   : > { %1162 = vmax.xlane.f32.xlu1 %v1161_v59  ;;  %v1741_v22 = vsel %vm1297_vm7, 1.0, %v1846_v2  ;;  %v1742_v6 = vsel %vm1298_vm8, 1.0, %v1846_v2  ;;  %v1744_v25 = vsel %vm1300_vm9, 1.0, %v1846_v2  ;;  %v1743_v37 = vsel %vm1299_vm10, 1.0, %v1846_v2 }
 0x1fa   : > { %v1438_v23 = vsel %vm1047_vm1, %v1741_v22, -inf  ;;  %v1441_v24 = vsel %vm1047_vm1, %v1742_v6, -inf }
 0x1fc   : > { %1165 = vmax.xlane.f32.xlu2 %v1164_v51 }
 0x1fd   : > { %1723 = vmatmul.msk.f32.gmra.mxu0 %vm572_vm2, %v1675_v36 }
 0x1fe   : > { %1168 = vmax.xlane.f32.xlu0 %v1167_v58 }
 0x200   : > { %1687 = vmatmul.msk.f32.gmra.mxu2 %vm572_vm2, %v1675_v36 }
 0x201   : > { %1171 = vmax.xlane.f32.xlu1 %v1170_v19 }
 0x204   : > { %1415 = vmax.xlane.f32.xlu2 %v1414_v17 }
 0x205   : > { %1724 = vmatmul.msk.f32.gmra.mxu0 %vm572_vm2, %v1676_v16 }
 0x206   : > { %1418 = vmax.xlane.f32.xlu0 %v1417_v62 }
 0x208   : > { %1688 = vmatmul.msk.f32.gmra.mxu2 %vm572_vm2, %v1676_v16 }
 0x209   : > { %1421 = vmax.xlane.f32.xlu1 %v1420_v20 }
 0x20c   : > { %1424 = vmax.xlane.f32.xlu2 %v1423_v3 }
 0x20d   : > { %1725 = vmatmul.msk.f32.gmra.mxu0 %vm572_vm2, %v1677_v26 }
 0x210   : > { %1689 = vmatmul.msk.f32.gmra.mxu2 %vm572_vm2, %v1677_v26 }
 0x211   : > { %1430 = vmax.xlane.f32.xlu1 %v1429_v50 }
 0x215   : > { %1726 = vmatmul.msk.f32.gmra.mxu0 %vm572_vm2, %v1678_v41 }
 0x218   : > { %1690 = vmatmul.msk.f32.gmra.mxu2 %vm572_vm2, %v1678_v41 }
 0x219   : > { %1439 = vmax.xlane.f32.xlu1 %v1438_v23 }
 0x21d   : > { %1727 = vmatmul.msk.f32.gmra.mxu0 %vm572_vm2, %v1679_v0 }
 0x220   : > { %1691 = vmatmul.msk.f32.gmra.mxu2 %vm572_vm2, %v1679_v0 }
 0x225   : > { %1728 = vmatmul.msk.f32.gmra.mxu0 %vm572_vm2, %v1680_v47 }
 0x228   : > { %1692 = vmatmul.msk.f32.gmra.mxu2 %vm572_vm2, %v1680_v47 }
 0x249   : > { %v2213_v7 = vpop.f32.mrf.mxu2 }
 0x251   : > { %v2265_v39 = vpop.f32.mrf.mxu3 }
 0x252   : > { %v821_v21 = vpop.f32.mrf.mxu2 }
 0x25b   : > { %v824_v29 = vpop.f32.mrf.mxu2 }
 0x25c   : > { %v1145_v30 = vpop.xlane.xlu1 %1144 }
 0x25d   : > { %vm1175_vm12 = vcmp.gt.f32.partialorder %v1145_v30, 0.0 }
 0x262   : > { %v1250_v33 = vpop.f32.mrf.mxu0 }
 0x263   : > { %v862_v38 = vpop.f32.mrf.mxu3  ;;  %v827_v43 = vpop.f32.mrf.mxu2 }
 0x264   : > { %1096 = vmatpush.msrb.mxu3 %v827_v43  ;;  %v2484_v34 = vpop.xlane.xlu1 %1153 }
 0x266   : > { %1097 = vmatpush.msrb.mxu3 %v824_v29 }
 0x268   : > { %1098 = vmatpush.msrb.mxu3 %v821_v21  ;;  %v1740_v21 = vsel %vm1296_vm6, 1.0, %v1846_v2 }
 0x269   : > { %v1435_v52 = vsel %vm1047_vm1, %v1740_v21, -inf }
 0x26a   : > { %1099 = vmatpush.msrb.mxu3 %v2213_v7  ;;  %v1426_v7 = vsel %vm1047_vm1, %v1737_v5, -inf }
 0x26b   : > { %v865_v49 = vpop.f32.mrf.mxu3  ;;  %1708 = vmatmul.msk.f32.vlgmr.msrb.gmra.mxu3 %vm1047_vm1, %v2218_v9  ;;  %1427 = vmax.xlane.f32.xlu0 %v1426_v7  ;;  %v1681_v9 = vsel %vm893_vm14, 1.0, %v1846_v2 }
 0x26c   : > { %1693 = vmatmul.msk.f32.gmra.mxu2 %vm572_vm2, %v1681_v9  ;;  %1729 = vmatmul.msk.f32.gmra.mxu0 %vm572_vm2, %v1681_v9 }
 0x273   : > { %v868_v18 = vpop.f32.mrf.mxu3  ;;  %1709 = vmatmul.msk.f32.gmra.mxu3 %vm1047_vm1, %v2238_v15  ;;  %v1432_v15 = vsel %vm1047_vm1, %v1739_v13, -inf  ;;  %1436 = vmax.xlane.f32.xlu0 %v1435_v52 }
 0x274   : > { %1373 = vmatpush.msrb.mxu1 %v868_v18  ;;  %1785 = vmatpush.msra.mxu3 %v868_v18 }
 0x275   : > { %1694 = vmatmul.msk.f32.gmra.mxu2 %vm572_vm2, %v1682_v11  ;;  %1433 = vmax.xlane.f32.xlu2 %v1432_v15 }
 0x276   : > { %1374 = vmatpush.msrb.mxu1 %v865_v49  ;;  %1786 = vmatpush.msra.mxu3 %v865_v49 }
 0x277   : > { %1730 = vmatmul.msk.f32.gmra.mxu0 %vm572_vm2, %v1682_v11 }
 0x278   : > { %1375 = vmatpush.msrb.mxu1 %v862_v38  ;;  %1787 = vmatpush.msra.mxu3 %v862_v38 }
 0x27a   : > { %1376 = vmatpush.msrb.mxu1 %v2265_v39  ;;  %1788 = vmatpush.msra.mxu3 %v2265_v39  ;;  %v1444_v39 = vsel %vm1047_vm1, %v1743_v37, -inf }
 0x27b   : > { %1745 = vmatmul.msk.f32.vlgmr.msrb.gmra.mxu1 %vm1047_vm1, %v1733_v53  ;;  %1710 = vmatmul.msk.f32.gmra.mxu3 %vm1047_vm1, %v2270_v8  ;;  %v1447_v8 = vsel %vm1047_vm1, %v1744_v25, -inf }
 0x27c   : > { %1445 = vmax.xlane.f32.xlu0 %v1444_v39  ;;  %1448 = vmax.xlane.f32.xlu1 %v1447_v8 }
 0x27d   : > { %1442 = vmax.xlane.f32.xlu2 %v1441_v24 }
 0x283   : > { %1746 = vmatmul.msk.f32.gmra.mxu1 %vm1047_vm1, %v1734_v57  ;;  %1711 = vmatmul.msk.f32.gmra.mxu3 %vm1047_vm1, %v2241_v4  ;;  %v1683_v4 = vsel %vm895_vm5, 1.0, %v1846_v2  ;;  %v1142_v2 = vpop.xlane.xlu0 %1141  ;;  %vm1178_vm5 = vcmp.gt.f32.partialorder %v2484_v34, 0.0 }
 0x284   : > { %1695 = vmatmul.msk.f32.gmra.mxu2 %vm572_vm2, %v1683_v4 }
 0x28b   : > { %1747 = vmatmul.msk.f32.gmra.mxu1 %vm1047_vm1, %v1735_v63  ;;  %1712 = vmatmul.msk.f32.gmra.mxu3 %vm1047_vm1, %v2273_v27  ;;  %v1139_v27 = vpop.xlane.xlu2 %1138  ;;  %v1151_v31 = vpop.xlane.xlu0 %1150 }
 0x28c   : > { %1731 = vmatmul.msk.f32.vlgmr.msra.gmra.mxu2 %vm572_vm2, %v1683_v4  ;;  %vm1173_vm2 = vcmp.gt.f32.partialorder %v1139_v27, 0.0  ;;  %vm1177_vm3 = vcmp.gt.f32.partialorder %v1151_v31, 0.0 }
 0x293   : > { %1748 = vmatmul.msk.f32.gmra.mxu1 %vm1047_vm1, %v1736_v1  ;;  %1713 = vmatmul.msk.f32.gmra.mxu3 %vm1047_vm1, %v2306_v40  ;;  %v1148_v29 = vpop.xlane.xlu2 %1147  ;;  %v2486_v35 = vpop.xlane.xlu0 %1159 }
 0x294   : > { %v1253_v40 = vpop.f32.mrf.mxu0  ;;  %vm1176_vm14 = vcmp.gt.f32.partialorder %v1148_v29, 0.0  ;;  %vm1180_vm9 = vcmp.gt.f32.partialorder %v2486_v35, 0.0 }
 0x29b   : > { %1749 = vmatmul.msk.f32.gmra.mxu1 %vm1047_vm1, %v1737_v5  ;;  %1714 = vmatmul.msk.f32.gmra.mxu3 %vm1047_vm1, %v2276_v28  ;;  %v973_v28 = vpop.f32.mrf.mxu2  ;;  %v2482_v32 = vpop.xlane.xlu2 %1156 }
 0x29c   : > { %v2500_v14 = vpop.xlane.xlu0 %1168  ;;  %v1256_v45 = vpop.f32.mrf.mxu0  ;;  %vm1179_vm7 = vcmp.gt.f32.partialorder %v2482_v32, 0.0 }
 0x2a3   : > { %1750 = vmatmul.msk.f32.gmra.mxu1 %vm1047_vm1, %v1738_v61  ;;  %1715 = vmatmul.msk.f32.gmra.mxu3 %vm1047_vm1, %v2309_v12  ;;  %v976_v10 = vpop.f32.mrf.mxu2  ;;  %v2488_v38 = vpop.xlane.xlu2 %1165 }
 0x2a4   : > { %v1259_v60 = vpop.f32.mrf.mxu0 }
 0x2ab   : > { %1751 = vmatmul.msk.f32.gmra.mxu1 %vm1047_vm1, %v1739_v13  ;;  %1716 = vmatmul.msk.f32.gmra.mxu3 %vm1047_vm1, %v2346_v55  ;;  %v979_v36 = vpop.f32.mrf.mxu2  ;;  %v1416_v51 = vpop.xlane.xlu2 %1415 }
 0x2ac   : > { %vm1450_vm11 = vcmp.gt.f32.partialorder %v1416_v51, 0.0  ;;  %v1262_v63 = vpop.f32.mrf.mxu0 }
 0x2b3   : > { %1752 = vmatmul.msk.f32.gmra.mxu1 %vm1047_vm1, %v1740_v21  ;;  %1717 = vmatmul.msk.f32.gmra.mxu3 %vm1047_vm1, %v2312_v42  ;;  %v2496_v42 = vpop.xlane.xlu1 %1162  ;;  %v982_v44 = vpop.f32.mrf.mxu2 }
 0x2b4   : > { %v1425_v20 = vpop.xlane.xlu2 %1424  ;;  %v1265_v9 = vpop.f32.mrf.mxu0 }
 0x2b5   : > { %vm1453_vm4 = vcmp.gt.f32.partialorder %v1425_v20, 0.0 }
 0x2bb   : > { %1753 = vmatmul.msk.f32.gmra.mxu1 %vm1047_vm1, %v1741_v22  ;;  %1718 = vmatmul.msk.f32.gmra.mxu3 %vm1047_vm1, %v2343_v54  ;;  %v2504_v53 = vpop.xlane.xlu1 %1171  ;;  %v1419_v54 = vpop.xlane.xlu0 %1418 }
 0x2bc   : > { %v985_v55 = vpop.f32.mrf.mxu2  ;;  %vm1451_vm13 = vcmp.gt.f32.partialorder %v1419_v54, 0.0  ;;  %v1268_v21 = vpop.f32.mrf.mxu0 }
 0x2c3   : > { %1754 = vmatmul.msk.f32.gmra.mxu1 %vm1047_vm1, %v1742_v6  ;;  %1719 = vmatmul.msk.f32.gmra.mxu3 %vm1047_vm1, %v2369_v56  ;;  %v1422_v18 = vpop.xlane.xlu1 %1421 }
 0x2c4   : > { %vm1452_vm15 = vcmp.gt.f32.partialorder %v1422_v18, 0.0  ;;  %v988_v56 = vpop.f32.mrf.mxu2  ;;  %v1271_v27 = vpop.f32.mrf.mxu0 }
 0x2cb   : > { %1755 = vmatmul.msk.f32.gmra.mxu1 %vm1047_vm1, %v1743_v37  ;;  %1756 = vmatmul.msk.f32.vlgmr.msra.gmra.mxu3 %vm1047_vm1, %v1744_v25  ;;  %vm1174_vm1 = vcmp.gt.f32.partialorder %v1142_v2, 0.0  ;;  %v1431_v4 = vpop.xlane.xlu1 %1430 }
 0x2cc   : > { %v991_v47 = vpop.f32.mrf.mxu2  ;;  %vm1455_vm8 = vcmp.gt.f32.partialorder %v1431_v4, 0.0 }
 0x2d3   : > { %v1440_v34 = vpop.xlane.xlu1 %1439 }
 0x2d4   : > { %v994_v15 = vpop.f32.mrf.mxu2 }
 0x2dc   : > { %v997_v25 = vpop.f32.mrf.mxu2 }
 0x2de   : > { %v1428_v7 = vpop.xlane.xlu0 %1427 }
 0x2df   : > { %vm1454_vm6 = vcmp.gt.f32.partialorder %v1428_v7, 0.0 }
 0x2e8   : > { %v1434_v24 = vpop.xlane.xlu2 %1433 }
 0x2e9   : > { %vm1456_vm10 = vcmp.gt.f32.partialorder %v1434_v24, 0.0 }
 0x2ee   : > { %v1101_v12 = vpop.f32.mrf.mxu3 }
 0x2ef   : > { %v1209_v43 = vsel %vm1173_vm2, %v1101_v12, %v973_v28  ;;  %v1437_v28 = vpop.xlane.xlu0 %1436  ;;  %v1000_v30 = vpop.f32.mrf.mxu2 }
 0x2f0   : > { %1221 = vst.msk [vmem:[%s2494_s15] sm:$0xff] %vm367_vm0, %v1209_v43  ;;  %vm1457_vm2 = vcmp.gt.f32.partialorder %v1437_v28, 0.0  ;;  %v1443_v43 = vpop.xlane.xlu2 %1442 }
 0x2f6   : > { %v1104_v46 = vpop.f32.mrf.mxu3 }
 0x2f7   : > { %v1210_v48 = vsel %vm1174_vm1, %v1104_v46, %v976_v10  ;;  %vm1181_vm1 = vcmp.gt.f32.partialorder %v2496_v42, 0.0 }
 0x2f8   : > { %v1378_v16 = vpop.f32.mrf.mxu1  ;;  %1222 = vst.msk [vmem:[%s2494_s15 + $0x8] sm:$0xff] %vm367_vm0, %v1210_v48  ;;  %v1003_v12 = vpop.f32.mrf.mxu2 }
 0x2f9   : > { %v1486_v49 = vsel %vm1450_vm11, %v1378_v16, %v1250_v33  ;;  %v1274_v33 = vpop.f32.mrf.mxu0  ;;  %vm1458_vm11 = vcmp.gt.f32.partialorder %v1440_v34, 0.0  ;;  %v1446_v16 = vpop.xlane.xlu0 %1445 }
 0x2fa   : > { %1757 = vst.msk [vmem:[%s2494_s15 + $0x60] sm:$0xff] %vm367_vm0, %v1486_v49 }
 0x2fe   : > { %v1107_v58 = vpop.f32.mrf.mxu3 }
 0x2ff   : > { %v1211_v17 = vsel %vm1175_vm12, %v1107_v58, %v979_v36  ;;  %vm1182_vm12 = vcmp.gt.f32.partialorder %v2488_v38, 0.0 }
 0x300   : > { %v1381_v59 = vpop.f32.mrf.mxu1  ;;  %1223 = vst.msk [vmem:[%s2494_s15 + $0x10] sm:$0xff] %vm367_vm0, %v1211_v17  ;;  %v1449_v17 = vpop.xlane.xlu1 %1448 }
 0x301   : > { %v1487_v26 = vsel %vm1451_vm13, %v1381_v59, %v1253_v40  ;;  %vm1459_vm13 = vcmp.gt.f32.partialorder %v1443_v43, 0.0 }
 0x302   : > { %1758 = vst.msk [vmem:[%s2494_s15 + $0x68] sm:$0xff] %vm367_vm0, %v1487_v26 }
 0x306   : > { %v1110_v57 = vpop.f32.mrf.mxu3 }
 0x307   : > { %v1212_v62 = vsel %vm1176_vm14, %v1110_v57, %v982_v44  ;;  %v1277_v44 = vpop.f32.mrf.mxu0  ;;  %vm1183_vm14 = vcmp.gt.f32.partialorder %v2500_v14, 0.0  ;;  %v1006_v48 = vpop.f32.mrf.mxu2 }
 0x308   : > { %v1384_v19 = vpop.f32.mrf.mxu1  ;;  %1224 = vst.msk [vmem:[%s2494_s15 + $0x18] sm:$0xff] %vm367_vm0, %v1212_v62 }
 0x309   : > { %v1488_v41 = vsel %vm1452_vm15, %v1384_v19, %v1256_v45  ;;  %vm1460_vm15 = vcmp.gt.f32.partialorder %v1446_v16, 0.0 }
 0x30a   : > { %1759 = vst.msk [vmem:[%s2494_s15 + $0x70] sm:$0xff] %vm367_vm0, %v1488_v41 }
 0x30e   : > { %v1113_v0 = vpop.f32.mrf.mxu3 }
 0x30f   : > { %v1213_v1 = vsel %vm1177_vm3, %v1113_v0, %v985_v55  ;;  %v1280_v49 = vpop.f32.mrf.mxu0  ;;  %vm1184_vm3 = vcmp.gt.f32.partialorder %v2504_v53, 0.0  ;;  %v1283_v59 = vpop.f32.mrf.mxu2 }
 0x310   : > { %v1387_v3 = vpop.f32.mrf.mxu1  ;;  %1225 = vst.msk [vmem:[%s2494_s15 + $0x20] sm:$0xff] %vm367_vm0, %v1213_v1 }
 0x311   : > { %v1489_v5 = vsel %vm1453_vm4, %v1387_v3, %v1259_v60  ;;  %vm1461_vm4 = vcmp.gt.f32.partialorder %v1449_v17, 0.0 }
 0x312   : > { %1760 = vst.msk [vmem:[%s2494_s15 + $0x78] sm:$0xff] %vm367_vm0, %v1489_v5 }
 0x316   : > { %v1116_v61 = vpop.f32.mrf.mxu3 }
 0x317   : > { %v1214_v50 = vsel %vm1178_vm5, %v1116_v61, %v988_v56 }
 0x318   : > { %v1390_v11 = vpop.f32.mrf.mxu1  ;;  %1226 = vst.msk [vmem:[%s2494_s15 + $0x28] sm:$0xff] %vm367_vm0, %v1214_v50 }
 0x319   : > { %v1490_v13 = vsel %vm1454_vm6, %v1390_v11, %v1262_v63 }
 0x31a   : > { %1761 = vst.msk [vmem:[%s2494_s15 + $0x80] sm:$0xff] %vm367_vm0, %v1490_v13 }
 0x31e   : > { %v1119_v22 = vpop.f32.mrf.mxu3 }
 0x31f   : > { %v1215_v52 = vsel %vm1179_vm7, %v1119_v22, %v991_v47 }
 0x320   : > { %v1393_v23 = vpop.f32.mrf.mxu1  ;;  %1227 = vst.msk [vmem:[%s2494_s15 + $0x30] sm:$0xff] %vm367_vm0, %v1215_v52 }
 0x321   : > { %v1491_v6 = vsel %vm1455_vm8, %v1393_v23, %v1265_v9 }
 0x322   : > { %1762 = vst.msk [vmem:[%s2494_s15 + $0x88] sm:$0xff] %vm367_vm0, %v1491_v6 }
 0x326   : > { %v1122_v37 = vpop.f32.mrf.mxu3 }
 0x327   : > { %v1216_v39 = vsel %vm1180_vm9, %v1122_v37, %v994_v15 }
 0x328   : > { %v1396_v8 = vpop.f32.mrf.mxu1  ;;  %1228 = vst.msk [vmem:[%s2494_s15 + $0x38] sm:$0xff] %vm367_vm0, %v1216_v39 }
 0x329   : > { %v1492_v2 = vsel %vm1456_vm10, %v1396_v8, %v1268_v21 }
 0x32a   : > { %1763 = vst.msk [vmem:[%s2494_s15 + $0x90] sm:$0xff] %vm367_vm0, %v1492_v2 }
 0x32e   : > { %v1125_v29 = vpop.f32.mrf.mxu3 }
 0x32f   : > { %v1217_v31 = vsel %vm1181_vm1, %v1125_v29, %v997_v25 }
 0x330   : > { %v1399_v10 = vpop.f32.mrf.mxu1  ;;  %1229 = vst.msk [vmem:[%s2494_s15 + $0x40] sm:$0xff] %vm367_vm0, %v1217_v31 }
 0x331   : > { %v1493_v32 = vsel %vm1457_vm2, %v1399_v10, %v1271_v27 }
 0x332   : > { %1764 = vst.msk [vmem:[%s2494_s15 + $0x98] sm:$0xff] %vm367_vm0, %v1493_v32 }
 0x336   : > { %v1128_v35 = vpop.f32.mrf.mxu3 }
 0x337   : > { %v1218_v36 = vsel %vm1182_vm12, %v1128_v35, %v1000_v30 }
 0x338   : > { %v1402_v40 = vpop.f32.mrf.mxu1  ;;  %1230 = vst.msk [vmem:[%s2494_s15 + $0x48] sm:$0xff] %vm367_vm0, %v1218_v36 }
 0x339   : > { %v1494_v42 = vsel %vm1458_vm11, %v1402_v40, %v1274_v33 }
 0x33a   : > { %1765 = vst.msk [vmem:[%s2494_s15 + $0xa0] sm:$0xff] %vm367_vm0, %v1494_v42 }
 0x33e   : > { %v1131_v51 = vpop.f32.mrf.mxu3 }
 0x33f   : > { %v1219_v45 = vsel %vm1183_vm14, %v1131_v51, %v1003_v12 }
 0x340   : > { %v1405_v38 = vpop.f32.mrf.mxu1  ;;  %1231 = vst.msk [vmem:[%s2494_s15 + $0x50] sm:$0xff] %vm367_vm0, %v1219_v45 }
 0x341   : > { %v1495_v46 = vsel %vm1459_vm13, %v1405_v38, %v1277_v44 }
 0x342   : > { %1766 = vst.msk [vmem:[%s2494_s15 + $0xa8] sm:$0xff] %vm367_vm0, %v1495_v46 }
 0x346   : > { %v1134_v54 = vpop.f32.mrf.mxu3 }
 0x347   : > { %v1220_v55 = vsel %vm1184_vm3, %v1134_v54, %v1006_v48 }
 0x348   : > { %v1408_v58 = vpop.f32.mrf.mxu1  ;;  %1232 = vst.msk [vmem:[%s2494_s15 + $0x58] sm:$0xff] %vm367_vm0, %v1220_v55 }
 0x349   : > { %v1496_v14 = vsel %vm1460_vm15, %v1408_v58, %v1280_v49 }
 0x34a   : > { %1767 = vst.msk [vmem:[%s2494_s15 + $0xb0] sm:$0xff] %vm367_vm0, %v1496_v14 }
 0x34e   : > { %v1411_v60 = vpop.f32.mrf.mxu3 }
 0x34f   : > { %v1497_v26 = vsel %vm1461_vm4, %v1411_v60, %v1283_v59 }
 0x350   : > { %1768 = vst.msk [vmem:[%s2494_s15 + $0xb8] sm:$0xff] %vm367_vm0, %v1497_v26 }
 0x351 PF: > { %s15_s18 = sadd.s32 1, %s1843_s18  }
 0x352   : > { %p12_p4 = scmp.ge.s32.totalorder %s15_s18, 6  }
 0x354   :  { %14 = sbr.rel (!%p12_p4) target bundleno = 1 (0x1), region = 84 }

</bundles_post_ra>
